<compile_context>
chip_gen: v7x
topology: tpu7x:2x2x1
jax: 0.10.0
libtpu: 0.0.40
codegen_flags: <defaults>
</compile_context>

<pallas_src>
import functools
import math

import jax
import jax.numpy as jnp
from jax.experimental import pallas as pl
from jax.experimental.pallas import tpu as pltpu


_BN_EPS = 1e-5
_ENC1_CIN_PAD = 8           # pad enc1 input channels 3 -> 8 (K: 27 -> 72)
_MAX_TM = 8192              # upper bound on the pixel tile (lane) size


# ----------------------------- Pallas kernel --------------------------------

def _conv_bn_act_kernel(w_ref, p_ref, b_ref, o_ref, *, act):
    """Fused im2col-matmul (transposed, lane-dense out) + folded-BN bias + act.

    w_ref: (Cout, 9*Cin) bf16 BN-scale-folded weights
    p_ref: (9*Cin, tm)   bf16 patch tile (pixels on lanes)
    b_ref: (Cout, 1)     f32 folded bias
    o_ref: (Cout, tm)    output tile (lane-dense store)
    """
    acc = jnp.dot(w_ref[...], p_ref[...], preferred_element_type=jnp.float32)
    y = acc + b_ref[...]                  # f32 finalize (v5e-safe)
    if act == "relu":
        y = jnp.maximum(y, 0.0)
    elif act == "tanh":
        y = jnp.tanh(y)
    o_ref[...] = y.astype(o_ref.dtype)


# --------------------------- Tiling / VMEM policy ----------------------------

def _round_up(x, m):
    return ((x + m - 1) // m) * m


@functools.lru_cache(maxsize=None)
def _vmem_budget_bytes():
    """Per-block VMEM budget: 48 MiB on 128-MiB parts, 32 MiB on v7x (64 MiB)."""
    try:
        cap = int(pltpu.get_tpu_info().vmem_capacity_bytes)
    except Exception:
        cap = 64 * 1024 * 1024          # conservative (v7x-sized) fallback
    return min(48 * 1024 * 1024, cap // 2)


@functools.lru_cache(maxsize=None)
def _default_scoped_vmem_bytes():
    """Per-generation default scoped-VMEM limit (16 MiB v5e, 32 MiB v6e/v7x)."""
    try:
        kind = jax.devices()[0].device_kind.lower()
    except Exception:
        kind = ""
    if ("v6" in kind) or ("v7" in kind) or ("7x" in kind):
        return 32 * 1024 * 1024
    return 16 * 1024 * 1024             # v5e / unknown: conservative


def _per_block_bytes(tm, K, Cout, out_itemsize):
    # double-buffered patch + output columns, plus double-buffered weights/bias
    return 2 * (K * 2 + Cout * out_itemsize) * tm + 2 * (Cout * K * 2 + Cout * 4)


def _choose_tile(M, K, Cout, out_itemsize):
    budget = _vmem_budget_bytes()
    per_col = 2 * (K * 2 + Cout * out_itemsize)
    fixed = 2 * (Cout * K * 2 + Cout * 4)
    avail = max(budget - fixed, 128 * per_col)
    tm = (avail // per_col) // 128 * 128
    tm = max(128, min(tm, _MAX_TM))
    # Dual-TensorCore (v7x): keep >= 2 grid blocks whenever there is enough
    # work that each half still fills at least one 128-lane group.
    if M > 2 * 128:
        tm = min(tm, _round_up(_round_up(M, 128) // 2, 128))
    tm = min(tm, _round_up(M, 128))
    return tm


# --------------------------- Fused conv block call ---------------------------

def conv3x3_bn_act(x, w_t, bias, act, out_dtype):
    """x: (Cin, N, H, W) bf16; w_t: (Cout, 9*Cin) bf16; bias: (Cout, 1) f32."""
    C, N, H, W = x.shape
    Cout, K = w_t.shape
    assert K == 9 * C
    M = N * H * W

    # Glue (XLA-fused under jit): zero-pad + 9 shifted taps concatenated along
    # the channel axis -> transposed im2col (9*Cin, M), matching the
    # (3,3,Cin,Cout) -> (9*Cin, Cout) weight flattening order.
    xp = jnp.pad(x, ((0, 0), (0, 0), (1, 1), (1, 1)))
    pt = jnp.concatenate(
        [xp[:, :, dy:dy + H, dx:dx + W] for dy in range(3) for dx in range(3)],
        axis=0).reshape(K, M)

    out_itemsize = jnp.dtype(out_dtype).itemsize
    tm = _choose_tile(M, K, Cout, out_itemsize)
    m_pad = _round_up(M, tm)            # tm always divides m_pad: no partial blocks
    if m_pad != M:
        pt = jnp.pad(pt, ((0, 0), (0, m_pad - M)))

    cparams = {"dimension_semantics": ("parallel",)}
    est = _per_block_bytes(tm, K, Cout, out_itemsize)
    if est > _default_scoped_vmem_bytes():
        cparams["vmem_limit_bytes"] = int(_vmem_budget_bytes())

    out = pl.pallas_call(
        functools.partial(_conv_bn_act_kernel, act=act),
        out_shape=jax.ShapeDtypeStruct((Cout, m_pad), out_dtype),
        grid_spec=pltpu.PrefetchScalarGridSpec(
            num_scalar_prefetch=0,
            grid=(m_pad // tm,),
            in_specs=[
                pl.BlockSpec((Cout, K), lambda i: (0, 0)),   # weights (resident)
                pl.BlockSpec((K, tm), lambda i: (0, i)),     # patch tile
                pl.BlockSpec((Cout, 1), lambda i: (0, 0)),   # folded bias
            ],
            out_specs=pl.BlockSpec((Cout, tm), lambda i: (0, i)),  # lane-dense
        ),
        compiler_params=pltpu.CompilerParams(**cparams),
    )(w_t, pt, bias)

    return out[:, :M].reshape(Cout, N, H, W)


# ------------------------------ JAX glue ops ---------------------------------

def avg_pool(x, k):
    """AvgPool2d(kernel=k, stride=k) on (C, N, H, W)."""
    if k == 1:
        return x
    C, N, H, W = x.shape
    return x.reshape(C, N, H // k, k, W // k, k).mean(axis=(3, 5))


def upsample_nearest(x, s):
    """UpsamplingNearest2d(scale_factor=s) on (C, N, H, W)."""
    if s == 1:
        return x
    return jnp.repeat(jnp.repeat(x, s, axis=2), s, axis=3)


# ------------------------------ Parameters -----------------------------------

def _init_conv(key, cin, cout):
    """Deterministic PyTorch-like uniform init for a 3x3 conv (HWIO layout)."""
    wk, bk = jax.random.split(key)
    bound = 1.0 / math.sqrt(cin * 9)
    w = jax.random.uniform(wk, (3, 3, cin, cout), jnp.float32, -bound, bound)
    b = jax.random.uniform(bk, (cout,), jnp.float32, -bound, bound)
    return w, b


def init_generator_params(key):
    specs = [
        ("enc1", 3, 8), ("enc2", 8, 16), ("enc3", 16, 32), ("enc4", 32, 64),
        ("dec1", 64, 32), ("dec2", 64, 16), ("dec3", 32, 8), ("dec4", 16, 3),
    ]
    params = {}
    keys = jax.random.split(key, len(specs))
    for k_, (name, cin, cout) in zip(keys, specs):
        w, b = _init_conv(k_, cin, cout)
        if name == "enc1":
            # Zero-pad input channels 3 -> 8 so K = 72 (8-sublane aligned).
            w = jnp.pad(w, ((0, 0), (0, 0), (0, _ENC1_CIN_PAD - cin), (0, 0)))
            cin = _ENC1_CIN_PAD
        if name == "dec4":                       # Conv + Tanh (no BN)
            scale = 1.0
        else:                                    # eval-mode BN folding
            scale = 1.0 / math.sqrt(1.0 + _BN_EPS)
        w_t = jnp.transpose((w * scale).reshape(9 * cin, cout)).astype(jnp.bfloat16)
        bias = (b * scale).reshape(cout, 1).astype(jnp.float32)
        params[name] = (w_t, bias)
    return params


# ------------------------------ Forward pass ----------------------------------

def generator_forward(params, x_cnhw):
    x = x_cnhw.astype(jnp.bfloat16)
    # enc1 input-channel pad 3 -> 8 (zero channels, matching zero weight rows).
    x = jnp.pad(x, ((0, _ENC1_CIN_PAD - x.shape[0]), (0, 0), (0, 0), (0, 0)))

    def block(name, h, pool=None, up=None, act="relu", out_dtype=jnp.bfloat16):
        if pool is not None:
            h = avg_pool(h, pool)
        if up is not None:
            h = upsample_nearest(h, up)
        w_t, bias = params[name]
        return conv3x3_bn_act(h, w_t, bias, act, out_dtype)

    x1 = block("enc1", x)
    x2 = block("enc2", x1, pool=2)
    x3 = block("enc3", x2, pool=1)
    x4 = block("enc4", x3, pool=3)
    out = block("dec1", x4, up=3)
    out = block("dec2", jnp.concatenate([out, x3], axis=0), up=1)
    out = block("dec3", jnp.concatenate([out, x2], axis=0), up=2)
    out = block("dec4", jnp.concatenate([out, x1], axis=0),
                act="tanh", out_dtype=jnp.float32)
    return out            # (3, N, H, W)


# ------------------------------ Entry point -----------------------------------

if __name__ == "__main__":
    key = jax.random.PRNGKey(0)
    pkey, xkey = jax.random.split(key)

    params = init_generator_params(pkey)

    # NCHW input like the PyTorch reference; H, W divisible by 6 so the U-Net
    # pool(2)/pool(3)/upsample skips line up.  NOTE: the 12x12 toy size is
    # dispatch/latency-bound — per-kernel tuning must be benchmarked at
    # realistic H, W with xprof.
    x_nchw = jax.random.normal(xkey, (2, 3, 12, 12), jnp.float32)
    x_cnhw = jnp.transpose(x_nchw, (1, 0, 2, 3))       # -> (C, N, H, W)

    fwd = jax.jit(generator_forward)
    out_cnhw = fwd(params, x_cnhw)
    out_nchw = jnp.transpose(out_cnhw, (1, 0, 2, 3))   # -> (N, C, H, W)
    out_nchw = jax.block_until_ready(out_nchw)

    assert out_nchw.shape == (2, 3, 12, 12), out_nchw.shape
    assert bool(jnp.all(jnp.isfinite(out_nchw)))
    assert bool(jnp.all(jnp.abs(out_nchw) <= 1.0))     # tanh output range
    print("KERNEL_OK")
</pallas_src>

<mosaic_0001>
module attributes {stable_mosaic.version = 11 : i64} {
  func.func @_conv_bn_act_kernel(%arg0: i32, %arg1: memref<8x72xbf16, #tpu.memory_space<vmem>>, %arg2: memref<72x256xbf16, #tpu.memory_space<vmem>>, %arg3: memref<8x1xf32, #tpu.memory_space<vmem>>, %arg4: memref<8x256xbf16, #tpu.memory_space<vmem>>) attributes {dimension_semantics = [#tpu.dimension_semantics<parallel>], iteration_bounds = array<i64: 2>, scalar_prefetch = 0 : i64, scratch_operands = 0 : i64, tpu.core_type = #tpu.core_type<tc>, window_params = [{pipeline_mode = #tpu.pipeline_mode<synchronous>, transform_indices = @transform_0, window_bounds = array<i64: 8, 72>}, {transform_indices = @transform_1, window_bounds = array<i64: 72, 256>}, {pipeline_mode = #tpu.pipeline_mode<synchronous>, transform_indices = @transform_2, window_bounds = array<i64: 8, 1>}, {transform_indices = @transform_3, window_bounds = array<i64: 8, 256>}]} {
    %c0 = arith.constant 0 : index
    %c0_0 = arith.constant 0 : index
    %0 = vector.load %arg1[%c0, %c0_0] : memref<8x72xbf16, #tpu.memory_space<vmem>>, vector<8x72xbf16>
    %c0_1 = arith.constant 0 : index
    %c0_2 = arith.constant 0 : index
    %1 = vector.load %arg2[%c0_1, %c0_2] : memref<72x256xbf16, #tpu.memory_space<vmem>>, vector<72x256xbf16>
    %cst = arith.constant dense<0.000000e+00> : vector<8x256xf32>
    %2 = tpu.matmul %0, %1, %cst {dimension_numbers = #tpu.dot_dimension_numbers<[1], [0], [0], [1], [0, 0, 1, 1], [], []>} : vector<8x72xbf16>, vector<72x256xbf16>, vector<8x256xf32> -> vector<8x256xf32>
    %c0_3 = arith.constant 0 : index
    %c0_4 = arith.constant 0 : index
    %3 = vector.load %arg3[%c0_3, %c0_4] : memref<8x1xf32, #tpu.memory_space<vmem>>, vector<8x1xf32>
    %4 = vector.broadcast %3 : vector<8x1xf32> to vector<8x256xf32>
    %5 = arith.addf %2, %4 : vector<8x256xf32>
    %cst_5 = arith.constant 0.000000e+00 : f32
    %6 = vector.broadcast %cst_5 : f32 to vector<8x256xf32>
    %7 = arith.maximumf %5, %6 : vector<8x256xf32>
    %8 = arith.truncf %7 : vector<8x256xf32> to vector<8x256xbf16>
    %c0_6 = arith.constant 0 : index
    %c0_7 = arith.constant 0 : index
    %9 = vector.load %arg4[%c0_6, %c0_7] : memref<8x256xbf16, #tpu.memory_space<vmem>>, vector<8x256xbf16>
    tpu.vector_store %arg4[%c0_6, %c0_7], %8 {strides = array<i32>} : memref<8x256xbf16, #tpu.memory_space<vmem>>, vector<8x256xbf16>,
    return
  }
  func.func @transform_0(%arg0: i32) -> (i32, i32) {
    %c0_i32 = arith.constant 0 : i32
    %c0_i32_0 = arith.constant 0 : i32
    %c0_i32_1 = arith.constant 0 : i32
    return %c0_i32, %c0_i32_0 : i32, i32
  }
  func.func @transform_1(%arg0: i32) -> (i32, i32) {
    %c0_i32 = arith.constant 0 : i32
    %c0_i32_0 = arith.constant 0 : i32
    return %c0_i32, %arg0 : i32, i32
  }
  func.func @transform_2(%arg0: i32) -> (i32, i32) {
    %c0_i32 = arith.constant 0 : i32
    %c0_i32_0 = arith.constant 0 : i32
    %c0_i32_1 = arith.constant 0 : i32
    return %c0_i32, %c0_i32_0 : i32, i32
  }
  func.func @transform_3(%arg0: i32) -> (i32, i32) {
    %c0_i32 = arith.constant 0 : i32
    %c0_i32_0 = arith.constant 0 : i32
    return %c0_i32, %arg0 : i32, i32
  }
}

module attributes {stable_mosaic.version = 11 : i64} {
  func.func @_conv_bn_act_kernel(%arg0: i32, %arg1: memref<16x72xbf16, #tpu.memory_space<vmem>>, %arg2: memref<72x128xbf16, #tpu.memory_space<vmem>>, %arg3: memref<16x1xf32, #tpu.memory_space<vmem>>, %arg4: memref<16x128xbf16, #tpu.memory_space<vmem>>) attributes {dimension_semantics = [#tpu.dimension_semantics<parallel>], iteration_bounds = array<i64: 1>, scalar_prefetch = 0 : i64, scratch_operands = 0 : i64, tpu.core_type = #tpu.core_type<tc>, window_params = [{pipeline_mode = #tpu.pipeline_mode<synchronous>, transform_indices = @transform_0, window_bounds = array<i64: 16, 72>}, {transform_indices = @transform_1, window_bounds = array<i64: 72, 128>}, {pipeline_mode = #tpu.pipeline_mode<synchronous>, transform_indices = @transform_2, window_bounds = array<i64: 16, 1>}, {transform_indices = @transform_3, window_bounds = array<i64: 16, 128>}]} {
    %c0 = arith.constant 0 : index
    %c0_0 = arith.constant 0 : index
    %0 = vector.load %arg1[%c0, %c0_0] : memref<16x72xbf16, #tpu.memory_space<vmem>>, vector<16x72xbf16>
    %c0_1 = arith.constant 0 : index
    %c0_2 = arith.constant 0 : index
    %1 = vector.load %arg2[%c0_1, %c0_2] : memref<72x128xbf16, #tpu.memory_space<vmem>>, vector<72x128xbf16>
    %cst = arith.constant dense<0.000000e+00> : vector<16x128xf32>
    %2 = tpu.matmul %0, %1, %cst {dimension_numbers = #tpu.dot_dimension_numbers<[1], [0], [0], [1], [0, 0, 1, 1], [], []>} : vector<16x72xbf16>, vector<72x128xbf16>, vector<16x128xf32> -> vector<16x128xf32>
    %c0_3 = arith.constant 0 : index
    %c0_4 = arith.constant 0 : index
    %3 = vector.load %arg3[%c0_3, %c0_4] : memref<16x1xf32, #tpu.memory_space<vmem>>, vector<16x1xf32>
    %4 = vector.broadcast %3 : vector<16x1xf32> to vector<16x128xf32>
    %5 = arith.addf %2, %4 : vector<16x128xf32>
    %cst_5 = arith.constant 0.000000e+00 : f32
    %6 = vector.broadcast %cst_5 : f32 to vector<16x128xf32>
    %7 = arith.maximumf %5, %6 : vector<16x128xf32>
    %8 = arith.truncf %7 : vector<16x128xf32> to vector<16x128xbf16>
    %c0_6 = arith.constant 0 : index
    %c0_7 = arith.constant 0 : index
    %9 = vector.load %arg4[%c0_6, %c0_7] : memref<16x128xbf16, #tpu.memory_space<vmem>>, vector<16x128xbf16>
    tpu.vector_store %arg4[%c0_6, %c0_7], %8 {strides = array<i32>} : memref<16x128xbf16, #tpu.memory_space<vmem>>, vector<16x128xbf16>,
    return
  }
  func.func @transform_0(%arg0: i32) -> (i32, i32) {
    %c0_i32 = arith.constant 0 : i32
    %c0_i32_0 = arith.constant 0 : i32
    %c0_i32_1 = arith.constant 0 : i32
    return %c0_i32, %c0_i32_0 : i32, i32
  }
  func.func @transform_1(%arg0: i32) -> (i32, i32) {
    %c0_i32 = arith.constant 0 : i32
    %c0_i32_0 = arith.constant 0 : i32
    return %c0_i32, %arg0 : i32, i32
  }
  func.func @transform_2(%arg0: i32) -> (i32, i32) {
    %c0_i32 = arith.constant 0 : i32
    %c0_i32_0 = arith.constant 0 : i32
    %c0_i32_1 = arith.constant 0 : i32
    return %c0_i32, %c0_i32_0 : i32, i32
  }
  func.func @transform_3(%arg0: i32) -> (i32, i32) {
    %c0_i32 = arith.constant 0 : i32
    %c0_i32_0 = arith.constant 0 : i32
    return %c0_i32, %arg0 : i32, i32
  }
}

module attributes {stable_mosaic.version = 11 : i64} {
  func.func @_conv_bn_act_kernel(%arg0: i32, %arg1: memref<32x144xbf16, #tpu.memory_space<vmem>>, %arg2: memref<144x128xbf16, #tpu.memory_space<vmem>>, %arg3: memref<32x1xf32, #tpu.memory_space<vmem>>, %arg4: memref<32x128xbf16, #tpu.memory_space<vmem>>) attributes {dimension_semantics = [#tpu.dimension_semantics<parallel>], iteration_bounds = array<i64: 1>, scalar_prefetch = 0 : i64, scratch_operands = 0 : i64, tpu.core_type = #tpu.core_type<tc>, window_params = [{pipeline_mode = #tpu.pipeline_mode<synchronous>, transform_indices = @transform_0, window_bounds = array<i64: 32, 144>}, {transform_indices = @transform_1, window_bounds = array<i64: 144, 128>}, {pipeline_mode = #tpu.pipeline_mode<synchronous>, transform_indices = @transform_2, window_bounds = array<i64: 32, 1>}, {transform_indices = @transform_3, window_bounds = array<i64: 32, 128>}]} {
    %c0 = arith.constant 0 : index
    %c0_0 = arith.constant 0 : index
    %0 = vector.load %arg1[%c0, %c0_0] : memref<32x144xbf16, #tpu.memory_space<vmem>>, vector<32x144xbf16>
    %c0_1 = arith.constant 0 : index
    %c0_2 = arith.constant 0 : index
    %1 = vector.load %arg2[%c0_1, %c0_2] : memref<144x128xbf16, #tpu.memory_space<vmem>>, vector<144x128xbf16>
    %cst = arith.constant dense<0.000000e+00> : vector<32x128xf32>
    %2 = tpu.matmul %0, %1, %cst {dimension_numbers = #tpu.dot_dimension_numbers<[1], [0], [0], [1], [0, 0, 1, 1], [], []>} : vector<32x144xbf16>, vector<144x128xbf16>, vector<32x128xf32> -> vector<32x128xf32>
    %c0_3 = arith.constant 0 : index
    %c0_4 = arith.constant 0 : index
    %3 = vector.load %arg3[%c0_3, %c0_4] : memref<32x1xf32, #tpu.memory_space<vmem>>, vector<32x1xf32>
    %4 = vector.broadcast %3 : vector<32x1xf32> to vector<32x128xf32>
    %5 = arith.addf %2, %4 : vector<32x128xf32>
    %cst_5 = arith.constant 0.000000e+00 : f32
    %6 = vector.broadcast %cst_5 : f32 to vector<32x128xf32>
    %7 = arith.maximumf %5, %6 : vector<32x128xf32>
    %8 = arith.truncf %7 : vector<32x128xf32> to vector<32x128xbf16>
    %c0_6 = arith.constant 0 : index
    %c0_7 = arith.constant 0 : index
    %9 = vector.load %arg4[%c0_6, %c0_7] : memref<32x128xbf16, #tpu.memory_space<vmem>>, vector<32x128xbf16>
    tpu.vector_store %arg4[%c0_6, %c0_7], %8 {strides = array<i32>} : memref<32x128xbf16, #tpu.memory_space<vmem>>, vector<32x128xbf16>,
    return
  }
  func.func @transform_0(%arg0: i32) -> (i32, i32) {
    %c0_i32 = arith.constant 0 : i32
    %c0_i32_0 = arith.constant 0 : i32
    %c0_i32_1 = arith.constant 0 : i32
    return %c0_i32, %c0_i32_0 : i32, i32
  }
  func.func @transform_1(%arg0: i32) -> (i32, i32) {
    %c0_i32 = arith.constant 0 : i32
    %c0_i32_0 = arith.constant 0 : i32
    return %c0_i32, %arg0 : i32, i32
  }
  func.func @transform_2(%arg0: i32) -> (i32, i32) {
    %c0_i32 = arith.constant 0 : i32
    %c0_i32_0 = arith.constant 0 : i32
    %c0_i32_1 = arith.constant 0 : i32
    return %c0_i32, %c0_i32_0 : i32, i32
  }
  func.func @transform_3(%arg0: i32) -> (i32, i32) {
    %c0_i32 = arith.constant 0 : i32
    %c0_i32_0 = arith.constant 0 : i32
    return %c0_i32, %arg0 : i32, i32
  }
}

module attributes {stable_mosaic.version = 11 : i64} {
  func.func @_conv_bn_act_kernel(%arg0: i32, %arg1: memref<64x288xbf16, #tpu.memory_space<vmem>>, %arg2: memref<288x128xbf16, #tpu.memory_space<vmem>>, %arg3: memref<64x1xf32, #tpu.memory_space<vmem>>, %arg4: memref<64x128xbf16, #tpu.memory_space<vmem>>) attributes {dimension_semantics = [#tpu.dimension_semantics<parallel>], iteration_bounds = array<i64: 1>, scalar_prefetch = 0 : i64, scratch_operands = 0 : i64, tpu.core_type = #tpu.core_type<tc>, window_params = [{pipeline_mode = #tpu.pipeline_mode<synchronous>, transform_indices = @transform_0, window_bounds = array<i64: 64, 288>}, {transform_indices = @transform_1, window_bounds = array<i64: 288, 128>}, {pipeline_mode = #tpu.pipeline_mode<synchronous>, transform_indices = @transform_2, window_bounds = array<i64: 64, 1>}, {transform_indices = @transform_3, window_bounds = array<i64: 64, 128>}]} {
    %c0 = arith.constant 0 : index
    %c0_0 = arith.constant 0 : index
    %0 = vector.load %arg1[%c0, %c0_0] : memref<64x288xbf16, #tpu.memory_space<vmem>>, vector<64x288xbf16>
    %c0_1 = arith.constant 0 : index
    %c0_2 = arith.constant 0 : index
    %1 = vector.load %arg2[%c0_1, %c0_2] : memref<288x128xbf16, #tpu.memory_space<vmem>>, vector<288x128xbf16>
    %cst = arith.constant dense<0.000000e+00> : vector<64x128xf32>
    %2 = tpu.matmul %0, %1, %cst {dimension_numbers = #tpu.dot_dimension_numbers<[1], [0], [0], [1], [0, 0, 1, 1], [], []>} : vector<64x288xbf16>, vector<288x128xbf16>, vector<64x128xf32> -> vector<64x128xf32>
    %c0_3 = arith.constant 0 : index
    %c0_4 = arith.constant 0 : index
    %3 = vector.load %arg3[%c0_3, %c0_4] : memref<64x1xf32, #tpu.memory_space<vmem>>, vector<64x1xf32>
    %4 = vector.broadcast %3 : vector<64x1xf32> to vector<64x128xf32>
    %5 = arith.addf %2, %4 : vector<64x128xf32>
    %cst_5 = arith.constant 0.000000e+00 : f32
    %6 = vector.broadcast %cst_5 : f32 to vector<64x128xf32>
    %7 = arith.maximumf %5, %6 : vector<64x128xf32>
    %8 = arith.truncf %7 : vector<64x128xf32> to vector<64x128xbf16>
    %c0_6 = arith.constant 0 : index
    %c0_7 = arith.constant 0 : index
    %9 = vector.load %arg4[%c0_6, %c0_7] : memref<64x128xbf16, #tpu.memory_space<vmem>>, vector<64x128xbf16>
    tpu.vector_store %arg4[%c0_6, %c0_7], %8 {strides = array<i32>} : memref<64x128xbf16, #tpu.memory_space<vmem>>, vector<64x128xbf16>,
    return
  }
  func.func @transform_0(%arg0: i32) -> (i32, i32) {
    %c0_i32 = arith.constant 0 : i32
    %c0_i32_0 = arith.constant 0 : i32
    %c0_i32_1 = arith.constant 0 : i32
    return %c0_i32, %c0_i32_0 : i32, i32
  }
  func.func @transform_1(%arg0: i32) -> (i32, i32) {
    %c0_i32 = arith.constant 0 : i32
    %c0_i32_0 = arith.constant 0 : i32
    return %c0_i32, %arg0 : i32, i32
  }
  func.func @transform_2(%arg0: i32) -> (i32, i32) {
    %c0_i32 = arith.constant 0 : i32
    %c0_i32_0 = arith.constant 0 : i32
    %c0_i32_1 = arith.constant 0 : i32
    return %c0_i32, %c0_i32_0 : i32, i32
  }
  func.func @transform_3(%arg0: i32) -> (i32, i32) {
    %c0_i32 = arith.constant 0 : i32
    %c0_i32_0 = arith.constant 0 : i32
    return %c0_i32, %arg0 : i32, i32
  }
}

module attributes {stable_mosaic.version = 11 : i64} {
  func.func @_conv_bn_act_kernel(%arg0: i32, %arg1: memref<32x576xbf16, #tpu.memory_space<vmem>>, %arg2: memref<576x128xbf16, #tpu.memory_space<vmem>>, %arg3: memref<32x1xf32, #tpu.memory_space<vmem>>, %arg4: memref<32x128xbf16, #tpu.memory_space<vmem>>) attributes {dimension_semantics = [#tpu.dimension_semantics<parallel>], iteration_bounds = array<i64: 1>, scalar_prefetch = 0 : i64, scratch_operands = 0 : i64, tpu.core_type = #tpu.core_type<tc>, window_params = [{pipeline_mode = #tpu.pipeline_mode<synchronous>, transform_indices = @transform_0, window_bounds = array<i64: 32, 576>}, {transform_indices = @transform_1, window_bounds = array<i64: 576, 128>}, {pipeline_mode = #tpu.pipeline_mode<synchronous>, transform_indices = @transform_2, window_bounds = array<i64: 32, 1>}, {transform_indices = @transform_3, window_bounds = array<i64: 32, 128>}]} {
    %c0 = arith.constant 0 : index
    %c0_0 = arith.constant 0 : index
    %0 = vector.load %arg1[%c0, %c0_0] : memref<32x576xbf16, #tpu.memory_space<vmem>>, vector<32x576xbf16>
    %c0_1 = arith.constant 0 : index
    %c0_2 = arith.constant 0 : index
    %1 = vector.load %arg2[%c0_1, %c0_2] : memref<576x128xbf16, #tpu.memory_space<vmem>>, vector<576x128xbf16>
    %cst = arith.constant dense<0.000000e+00> : vector<32x128xf32>
    %2 = tpu.matmul %0, %1, %cst {dimension_numbers = #tpu.dot_dimension_numbers<[1], [0], [0], [1], [0, 0, 1, 1], [], []>} : vector<32x576xbf16>, vector<576x128xbf16>, vector<32x128xf32> -> vector<32x128xf32>
    %c0_3 = arith.constant 0 : index
    %c0_4 = arith.constant 0 : index
    %3 = vector.load %arg3[%c0_3, %c0_4] : memref<32x1xf32, #tpu.memory_space<vmem>>, vector<32x1xf32>
    %4 = vector.broadcast %3 : vector<32x1xf32> to vector<32x128xf32>
    %5 = arith.addf %2, %4 : vector<32x128xf32>
    %cst_5 = arith.constant 0.000000e+00 : f32
    %6 = vector.broadcast %cst_5 : f32 to vector<32x128xf32>
    %7 = arith.maximumf %5, %6 : vector<32x128xf32>
    %8 = arith.truncf %7 : vector<32x128xf32> to vector<32x128xbf16>
    %c0_6 = arith.constant 0 : index
    %c0_7 = arith.constant 0 : index
    %9 = vector.load %arg4[%c0_6, %c0_7] : memref<32x128xbf16, #tpu.memory_space<vmem>>, vector<32x128xbf16>
    tpu.vector_store %arg4[%c0_6, %c0_7], %8 {strides = array<i32>} : memref<32x128xbf16, #tpu.memory_space<vmem>>, vector<32x128xbf16>,
    return
  }
  func.func @transform_0(%arg0: i32) -> (i32, i32) {
    %c0_i32 = arith.constant 0 : i32
    %c0_i32_0 = arith.constant 0 : i32
    %c0_i32_1 = arith.constant 0 : i32
    return %c0_i32, %c0_i32_0 : i32, i32
  }
  func.func @transform_1(%arg0: i32) -> (i32, i32) {
    %c0_i32 = arith.constant 0 : i32
    %c0_i32_0 = arith.constant 0 : i32
    return %c0_i32, %arg0 : i32, i32
  }
  func.func @transform_2(%arg0: i32) -> (i32, i32) {
    %c0_i32 = arith.constant 0 : i32
    %c0_i32_0 = arith.constant 0 : i32
    %c0_i32_1 = arith.constant 0 : i32
    return %c0_i32, %c0_i32_0 : i32, i32
  }
  func.func @transform_3(%arg0: i32) -> (i32, i32) {
    %c0_i32 = arith.constant 0 : i32
    %c0_i32_0 = arith.constant 0 : i32
    return %c0_i32, %arg0 : i32, i32
  }
}

module attributes {stable_mosaic.version = 11 : i64} {
  func.func @_conv_bn_act_kernel(%arg0: i32, %arg1: memref<16x576xbf16, #tpu.memory_space<vmem>>, %arg2: memref<576x128xbf16, #tpu.memory_space<vmem>>, %arg3: memref<16x1xf32, #tpu.memory_space<vmem>>, %arg4: memref<16x128xbf16, #tpu.memory_space<vmem>>) attributes {dimension_semantics = [#tpu.dimension_semantics<parallel>], iteration_bounds = array<i64: 1>, scalar_prefetch = 0 : i64, scratch_operands = 0 : i64, tpu.core_type = #tpu.core_type<tc>, window_params = [{pipeline_mode = #tpu.pipeline_mode<synchronous>, transform_indices = @transform_0, window_bounds = array<i64: 16, 576>}, {transform_indices = @transform_1, window_bounds = array<i64: 576, 128>}, {pipeline_mode = #tpu.pipeline_mode<synchronous>, transform_indices = @transform_2, window_bounds = array<i64: 16, 1>}, {transform_indices = @transform_3, window_bounds = array<i64: 16, 128>}]} {
    %c0 = arith.constant 0 : index
    %c0_0 = arith.constant 0 : index
    %0 = vector.load %arg1[%c0, %c0_0] : memref<16x576xbf16, #tpu.memory_space<vmem>>, vector<16x576xbf16>
    %c0_1 = arith.constant 0 : index
    %c0_2 = arith.constant 0 : index
    %1 = vector.load %arg2[%c0_1, %c0_2] : memref<576x128xbf16, #tpu.memory_space<vmem>>, vector<576x128xbf16>
    %cst = arith.constant dense<0.000000e+00> : vector<16x128xf32>
    %2 = tpu.matmul %0, %1, %cst {dimension_numbers = #tpu.dot_dimension_numbers<[1], [0], [0], [1], [0, 0, 1, 1], [], []>} : vector<16x576xbf16>, vector<576x128xbf16>, vector<16x128xf32> -> vector<16x128xf32>
    %c0_3 = arith.constant 0 : index
    %c0_4 = arith.constant 0 : index
    %3 = vector.load %arg3[%c0_3, %c0_4] : memref<16x1xf32, #tpu.memory_space<vmem>>, vector<16x1xf32>
    %4 = vector.broadcast %3 : vector<16x1xf32> to vector<16x128xf32>
    %5 = arith.addf %2, %4 : vector<16x128xf32>
    %cst_5 = arith.constant 0.000000e+00 : f32
    %6 = vector.broadcast %cst_5 : f32 to vector<16x128xf32>
    %7 = arith.maximumf %5, %6 : vector<16x128xf32>
    %8 = arith.truncf %7 : vector<16x128xf32> to vector<16x128xbf16>
    %c0_6 = arith.constant 0 : index
    %c0_7 = arith.constant 0 : index
    %9 = vector.load %arg4[%c0_6, %c0_7] : memref<16x128xbf16, #tpu.memory_space<vmem>>, vector<16x128xbf16>
    tpu.vector_store %arg4[%c0_6, %c0_7], %8 {strides = array<i32>} : memref<16x128xbf16, #tpu.memory_space<vmem>>, vector<16x128xbf16>,
    return
  }
  func.func @transform_0(%arg0: i32) -> (i32, i32) {
    %c0_i32 = arith.constant 0 : i32
    %c0_i32_0 = arith.constant 0 : i32
    %c0_i32_1 = arith.constant 0 : i32
    return %c0_i32, %c0_i32_0 : i32, i32
  }
  func.func @transform_1(%arg0: i32) -> (i32, i32) {
    %c0_i32 = arith.constant 0 : i32
    %c0_i32_0 = arith.constant 0 : i32
    return %c0_i32, %arg0 : i32, i32
  }
  func.func @transform_2(%arg0: i32) -> (i32, i32) {
    %c0_i32 = arith.constant 0 : i32
    %c0_i32_0 = arith.constant 0 : i32
    %c0_i32_1 = arith.constant 0 : i32
    return %c0_i32, %c0_i32_0 : i32, i32
  }
  func.func @transform_3(%arg0: i32) -> (i32, i32) {
    %c0_i32 = arith.constant 0 : i32
    %c0_i32_0 = arith.constant 0 : i32
    return %c0_i32, %arg0 : i32, i32
  }
}

module attributes {stable_mosaic.version = 11 : i64} {
  func.func @_conv_bn_act_kernel(%arg0: i32, %arg1: memref<8x288xbf16, #tpu.memory_space<vmem>>, %arg2: memref<288x256xbf16, #tpu.memory_space<vmem>>, %arg3: memref<8x1xf32, #tpu.memory_space<vmem>>, %arg4: memref<8x256xbf16, #tpu.memory_space<vmem>>) attributes {dimension_semantics = [#tpu.dimension_semantics<parallel>], iteration_bounds = array<i64: 2>, scalar_prefetch = 0 : i64, scratch_operands = 0 : i64, tpu.core_type = #tpu.core_type<tc>, window_params = [{pipeline_mode = #tpu.pipeline_mode<synchronous>, transform_indices = @transform_0, window_bounds = array<i64: 8, 288>}, {transform_indices = @transform_1, window_bounds = array<i64: 288, 256>}, {pipeline_mode = #tpu.pipeline_mode<synchronous>, transform_indices = @transform_2, window_bounds = array<i64: 8, 1>}, {transform_indices = @transform_3, window_bounds = array<i64: 8, 256>}]} {
    %c0 = arith.constant 0 : index
    %c0_0 = arith.constant 0 : index
    %0 = vector.load %arg1[%c0, %c0_0] : memref<8x288xbf16, #tpu.memory_space<vmem>>, vector<8x288xbf16>
    %c0_1 = arith.constant 0 : index
    %c0_2 = arith.constant 0 : index
    %1 = vector.load %arg2[%c0_1, %c0_2] : memref<288x256xbf16, #tpu.memory_space<vmem>>, vector<288x256xbf16>
    %cst = arith.constant dense<0.000000e+00> : vector<8x256xf32>
    %2 = tpu.matmul %0, %1, %cst {dimension_numbers = #tpu.dot_dimension_numbers<[1], [0], [0], [1], [0, 0, 1, 1], [], []>} : vector<8x288xbf16>, vector<288x256xbf16>, vector<8x256xf32> -> vector<8x256xf32>
    %c0_3 = arith.constant 0 : index
    %c0_4 = arith.constant 0 : index
    %3 = vector.load %arg3[%c0_3, %c0_4] : memref<8x1xf32, #tpu.memory_space<vmem>>, vector<8x1xf32>
    %4 = vector.broadcast %3 : vector<8x1xf32> to vector<8x256xf32>
    %5 = arith.addf %2, %4 : vector<8x256xf32>
    %cst_5 = arith.constant 0.000000e+00 : f32
    %6 = vector.broadcast %cst_5 : f32 to vector<8x256xf32>
    %7 = arith.maximumf %5, %6 : vector<8x256xf32>
    %8 = arith.truncf %7 : vector<8x256xf32> to vector<8x256xbf16>
    %c0_6 = arith.constant 0 : index
    %c0_7 = arith.constant 0 : index
    %9 = vector.load %arg4[%c0_6, %c0_7] : memref<8x256xbf16, #tpu.memory_space<vmem>>, vector<8x256xbf16>
    tpu.vector_store %arg4[%c0_6, %c0_7], %8 {strides = array<i32>} : memref<8x256xbf16, #tpu.memory_space<vmem>>, vector<8x256xbf16>,
    return
  }
  func.func @transform_0(%arg0: i32) -> (i32, i32) {
    %c0_i32 = arith.constant 0 : i32
    %c0_i32_0 = arith.constant 0 : i32
    %c0_i32_1 = arith.constant 0 : i32
    return %c0_i32, %c0_i32_0 : i32, i32
  }
  func.func @transform_1(%arg0: i32) -> (i32, i32) {
    %c0_i32 = arith.constant 0 : i32
    %c0_i32_0 = arith.constant 0 : i32
    return %c0_i32, %arg0 : i32, i32
  }
  func.func @transform_2(%arg0: i32) -> (i32, i32) {
    %c0_i32 = arith.constant 0 : i32
    %c0_i32_0 = arith.constant 0 : i32
    %c0_i32_1 = arith.constant 0 : i32
    return %c0_i32, %c0_i32_0 : i32, i32
  }
  func.func @transform_3(%arg0: i32) -> (i32, i32) {
    %c0_i32 = arith.constant 0 : i32
    %c0_i32_0 = arith.constant 0 : i32
    return %c0_i32, %arg0 : i32, i32
  }
}

module attributes {stable_mosaic.version = 11 : i64} {
  func.func @_conv_bn_act_kernel(%arg0: i32, %arg1: memref<3x144xbf16, #tpu.memory_space<vmem>>, %arg2: memref<144x256xbf16, #tpu.memory_space<vmem>>, %arg3: memref<3x1xf32, #tpu.memory_space<vmem>>, %arg4: memref<3x256xf32, #tpu.memory_space<vmem>>) attributes {dimension_semantics = [#tpu.dimension_semantics<parallel>], iteration_bounds = array<i64: 2>, scalar_prefetch = 0 : i64, scratch_operands = 0 : i64, tpu.core_type = #tpu.core_type<tc>, window_params = [{pipeline_mode = #tpu.pipeline_mode<synchronous>, transform_indices = @transform_0, window_bounds = array<i64: 3, 144>}, {transform_indices = @transform_1, window_bounds = array<i64: 144, 256>}, {pipeline_mode = #tpu.pipeline_mode<synchronous>, transform_indices = @transform_2, window_bounds = array<i64: 3, 1>}, {transform_indices = @transform_3, window_bounds = array<i64: 3, 256>}]} {
    %c0 = arith.constant 0 : index
    %c0_0 = arith.constant 0 : index
    %0 = vector.load %arg1[%c0, %c0_0] : memref<3x144xbf16, #tpu.memory_space<vmem>>, vector<3x144xbf16>
    %c0_1 = arith.constant 0 : index
    %c0_2 = arith.constant 0 : index
    %1 = vector.load %arg2[%c0_1, %c0_2] : memref<144x256xbf16, #tpu.memory_space<vmem>>, vector<144x256xbf16>
    %cst = arith.constant dense<0.000000e+00> : vector<3x256xf32>
    %2 = tpu.matmul %0, %1, %cst {dimension_numbers = #tpu.dot_dimension_numbers<[1], [0], [0], [1], [0, 0, 1, 1], [], []>} : vector<3x144xbf16>, vector<144x256xbf16>, vector<3x256xf32> -> vector<3x256xf32>
    %c0_3 = arith.constant 0 : index
    %c0_4 = arith.constant 0 : index
    %3 = vector.load %arg3[%c0_3, %c0_4] : memref<3x1xf32, #tpu.memory_space<vmem>>, vector<3x1xf32>
    %4 = vector.broadcast %3 : vector<3x1xf32> to vector<3x256xf32>
    %5 = arith.addf %2, %4 : vector<3x256xf32>
    %6 = math.tanh %5 : vector<3x256xf32>
    %c0_5 = arith.constant 0 : index
    %c0_6 = arith.constant 0 : index
    %7 = vector.load %arg4[%c0_5, %c0_6] : memref<3x256xf32, #tpu.memory_space<vmem>>, vector<3x256xf32>
    tpu.vector_store %arg4[%c0_5, %c0_6], %6 {strides = array<i32>} : memref<3x256xf32, #tpu.memory_space<vmem>>, vector<3x256xf32>,
    return
  }
  func.func @transform_0(%arg0: i32) -> (i32, i32) {
    %c0_i32 = arith.constant 0 : i32
    %c0_i32_0 = arith.constant 0 : i32
    %c0_i32_1 = arith.constant 0 : i32
    return %c0_i32, %c0_i32_0 : i32, i32
  }
  func.func @transform_1(%arg0: i32) -> (i32, i32) {
    %c0_i32 = arith.constant 0 : i32
    %c0_i32_0 = arith.constant 0 : i32
    return %c0_i32, %arg0 : i32, i32
  }
  func.func @transform_2(%arg0: i32) -> (i32, i32) {
    %c0_i32 = arith.constant 0 : i32
    %c0_i32_0 = arith.constant 0 : i32
    %c0_i32_1 = arith.constant 0 : i32
    return %c0_i32, %c0_i32_0 : i32, i32
  }
  func.func @transform_3(%arg0: i32) -> (i32, i32) {
    %c0_i32 = arith.constant 0 : i32
    %c0_i32_0 = arith.constant 0 : i32
    return %c0_i32, %arg0 : i32, i32
  }
}

</mosaic_0001>

<bundles_post_ra>
// kernel: generator_forward.8
= control target key start
LH: loop header
LB: loop body
LE: loop exit
PB: predicated region body
PF: predicated region fallthrough
CT: control target
= control target key end

     0   :  { %s540_s12 = smov 0   ;;  %s542_s13 = smov 0   ;;  %s598_s0 = inlined_call_operand.vmem [shape: bf16[8,72], index: 0, kind: input, shape index: {}]   ;;  %s599_s1 = inlined_call_operand.vmem [shape: bf16[72,512], index: 1, kind: input, shape index: {}]   ;;  %s600_s2 = inlined_call_operand.vmem [shape: f32[8,1], index: 2, kind: input, shape index: {}]   ;;  %s601_s3 = inlined_call_operand.vmem [shape: bf16[8,512], index: 3, kind: output, shape index: {}]  }
   0x1   :  { %s544_s14 = smov 0  }
   0x2 LB: > { %s427_s15 = sadd.s32 4294967295, %s517_s14   ;;  %s557_s16 = sadd.s32 1, %s517_s14   ;;  %s517_s14 = sphi %s544_s14, %s604_s14   ;;  %s513_s13 = sphi %s542_s13, %s603_s13   ;;  %s509_s12 = sphi %s540_s12, %s602_s12  }
   0x3   : > { %s38_s17 = ssub.s32 %s517_s14, %s557_s16  ;;  %s41_s18 = sadd.s32 1, %s513_s13 }
   0x4   : > { %p39_p0 = scmp.eq.s32.totalorder %s38_s17, 0  ;;  %p48_p1 = scmp.ne.s32.totalorder %s513_s13, %s509_s12 }
   0x5   : > { %p49_p2 = scmp.eq.s32.totalorder %s517_s14, 0  ;;  %p430_p4 = scmp.ge.s32.totalorder %s517_s14, 2 }
   0x6   : > { %s566_s19 = scalar_select %p39_p0, %s513_s13, %s41_s18  }
   0x7   : > { %p50_p3 = por %p49_p2, %p48_p1  ;;  %127 = sbr.rel (%p430_p4) target bundleno = 23 (0x17), region = 24 }
   0xe   : > { %130 = sbr.rel (!%p50_p3) target bundleno = 23 (0x17), region = 28  ;;  %s132_s20 = sand.u32 (%p50_p3), 1, %s513_s13  }
   0xf   : > { %s451_s21 = sshll.u32 (%p50_p3), %s517_s14, 3  ;;  %s453_s22 = smul.u32 (%p50_p3), 72, %s132_s20 }
  0x10   : > { %s137_s25 = scalar_lea.vmem (%p50_p3), %s599_s1, %s451_s21 }
  0x11   : > { %v181_v0 = vld [vmem:[%s137_s25] sm:$0xff] (%p50_p3)  ;;  %v183_v1 = vld [vmem:[%s137_s25 + $0x10] sm:$0xff] (%p50_p3)  ;;  %s134_s26 = scalar_lea.vmem (%p50_p3), [#allocation2], %s453_s22 }
  0x12   : > { %v185_v2 = vld [vmem:[%s137_s25 + $0x20] sm:$0xff] (%p50_p3)  ;;  %v187_v3 = vld [vmem:[%s137_s25 + $0x30] sm:$0xff] (%p50_p3)  ;;  %182 = vst [vmem:[%s134_s26] sm:$0xff] (%p50_p3), %v181_v0  ;;  %184 = vst [vmem:[%s134_s26 + $0x8] sm:$0xff] (%p50_p3), %v183_v1 }
  0x13   : > { %v189_v4 = vld [vmem:[%s137_s25 + $0x40] sm:$0xff] (%p50_p3)  ;;  %v191_v5 = vld [vmem:[%s137_s25 + $0x50] sm:$0xff] (%p50_p3)  ;;  %186 = vst [vmem:[%s134_s26 + $0x10] sm:$0xff] (%p50_p3), %v185_v2  ;;  %188 = vst [vmem:[%s134_s26 + $0x18] sm:$0xff] (%p50_p3), %v187_v3 }
  0x14   : > { %190 = vst [vmem:[%s134_s26 + $0x20] sm:$0xff] (%p50_p3), %v189_v4  ;;  %192 = vst [vmem:[%s134_s26 + $0x28] sm:$0xff] (%p50_p3), %v191_v5  ;;  %v193_v6 = vld [vmem:[%s137_s25 + $0x60] sm:$0xff] (%p50_p3)  ;;  %v195_v7 = vld [vmem:[%s137_s25 + $0x70] sm:$0xff] (%p50_p3) }
  0x15   : > { %v197_v8 = vld [vmem:[%s137_s25 + $0x80] sm:$0xff]  ;;  %194 = vst [vmem:[%s134_s26 + $0x30] sm:$0xff] %v193_v6  ;;  %196 = vst [vmem:[%s134_s26 + $0x38] sm:$0xff] %v195_v7 }
  0x16   : > { %198 = vst [vmem:[%s134_s26 + $0x40] sm:$0xff] %v197_v8 }
  0x17 PF: > { %p433_p5 = scmp.ge.s32.totalorder %s517_s14, 1  ;;  %p203_p6 = scmp.lt.s32.totalorder %s517_s14, 3 }
  0x19   : > { %p204_p7 = pnand %p433_p5, %p203_p6 }
  0x1a   : > { %s210_s27 = sand.u32 (!%p204_p7), 1, %s509_s12   ;;  %v519_v9 = vmov (!%p204_p7), 0   ;;  %v251_v10 = vld [vmem:[%s600_s2] sm:$0xff] (!%p204_p7)  ;;  %vm306_vm0 = vcmask (!%p204_p7), 1043456   ;;  %vm302_vm1 = vcmask (!%p204_p7), 588800   ;;  %s434_s7 = sshll.u32 (!%p204_p7), %s427_s15, 1 }
  0x1b   : > { %207 = sbr.rel (%p204_p7) target bundleno = 272 (0x110), region = 66  ;;  %345 = vmatprep.mubr.bf16.mxu0 (!%p204_p7), %v519_v9  ;;  %480 = vset.pattern.permute.xlu0 (!%p204_p7), %v519_v9  ;;  %v241_v23 = vld [vmem:[%s598_s0] sm:$0xf] (!%p204_p7)  ;;  %p235_p8 = scmp.lt.s32.totalorder (!%p204_p7), %s434_s7, 3 }
  0x1c   : > { %s454_s28 = smul.u32 (!%p204_p7), 72, %s210_s27  ;;  %254 = vperm.xlu0 (!%p204_p7), %480, %v251_v10  }
  0x1e   : > { %s212_s4 = scalar_lea.vmem (!%p204_p7), [#allocation2], %s454_s28 }
  0x1f   : > { %v481_v11 = vld [vmem:[%s212_s4 + $0x4] ss:$8 sps:$4 sm:$0xff] (!%p204_p7)   ;;  %v483_v12 = vld [vmem:[%s212_s4] ss:$8 sps:$4 sm:$0xff] (!%p204_p7)   ;;  %v484_v13 = vld [vmem:[%s212_s4 + $0x14] ss:$8 sps:$4 sm:$0xff] (!%p204_p7)  }
  0x20   : > { %313 = vmatprep.subr.bf16.mxu0 (!%p204_p7), %v481_v11  ;;  %v486_v14 = vld [vmem:[%s212_s4 + $0x10] ss:$8 sps:$4 sm:$0xff] (!%p204_p7)   ;;  %v487_v15 = vld [vmem:[%s212_s4 + $0x24] ss:$8 sps:$4 sm:$0xff] (!%p204_p7)   ;;  %v489_v16 = vld [vmem:[%s212_s4 + $0x20] ss:$8 sps:$4 sm:$0xff] (!%p204_p7)  }
  0x21   : > { %314 = vmatpush1.bf16.msra.mxu0 (!%p204_p7), %v483_v12  ;;  %v490_v17 = vld [vmem:[%s212_s4 + $0x34] ss:$8 sps:$4 sm:$0xff] (!%p204_p7)   ;;  %v250_v18 = vld [vmem:[%s212_s4 + $0x40] sm:$0xff] (!%p204_p7)  ;;  %v492_v19 = vld [vmem:[%s212_s4 + $0x30] ss:$8 sps:$4 sm:$0xff] (!%p204_p7)  }
  0x22   : > { %315 = vmatprep.subr.bf16.mxu0 %v484_v13  ;;  %v445_v20 = vcombine.high %v250_v18, %v250_v18  ;;  %v444_v21 = vcombine.low %v250_v18, %v250_v18  ;;  %s606_s7 = smov (!%p235_p8, %s434_s7), 3 }
  0x23   : > { %s435_s8 = sshll.u32 %s606_s7, 2 }
  0x24   : > { %v308_v22 = vsel %vm306_vm0, %v444_v21, 0  ;;  %s238_s11 = scalar_lea.vmem %s601_s3, %s435_s8 }
  0x25   : > { %316 = vmatpush1.bf16.msra.mxu0 %v486_v14 }
  0x26   : > { %317 = vmatprep.subr.bf16.mxu0 %v487_v15 }
  0x29   : > { %318 = vmatpush1.bf16.msra.mxu0 %v489_v16 }
  0x2a   : > { %319 = vmatprep.subr.bf16.mxu0 %v490_v17 }
  0x2d   : > { %320 = vmatpush1.bf16.msra.mxu0 %v492_v19 }
  0x2e   : > { %446 = vmatprep.subr.msk.bf16.mxu0 %vm306_vm0, %v445_v20 }
  0x31   : > { %322 = vmatpush1.bf16.msra.mxu0 %v308_v22 }
  0x34   : > { %447 = vmatmul.mubr.msk.bf16.vlgmr.msra.gmra.mrb[0].mxu0 %vm302_vm1, %v241_v23 }
  0x9b   : > { %v255_v24 = vpop.permute.xlu0 %254 }
 0x107   : > { %v347_v25 = vpop.f32.mrb[0].mxu0 }
 0x108   : > { %v348_v26 = vadd.f32 %v347_v25, %v255_v24  ;;  %v349_v27 = vpop.f32.mrb[1].mxu0 }
 0x109   : > { %v350_v28 = vadd.f32 %v349_v27, %v255_v24  ;;  %v351_v29 = vpop.f32.mrb[2].mxu0 }
 0x10a   : > { %v354_v30 = vmax.f32 %v348_v26, 0.0  ;;  %v352_v31 = vpop.f32.mrb[3].mxu0 }
 0x10b   : > { %v355_v32 = vmax.f32 %v350_v28, 0.0 }
 0x10d   : > { %v452_v33 = vpack.c.bf16 %v355_v32, %v354_v30 }
 0x10f   : > { %364 = vst [vmem:[%s238_s11] sm:$0xff] %v452_v33 }
 0x110 PF: > { %p10_p9 = scmp.ge.s32.totalorder %s557_s16, 4   ;;  %s602_s12 = smov %s513_s13 }
 0x111   : > { %s603_s13 = smov %s566_s19  ;;  %s604_s14 = smov %s557_s16 }
 0x112   :  { %12 = sbr.rel (!%p10_p9) target bundleno = 2 (0x2), region = 105 }

// kernel: generator_forward.9
= control target key start
LH: loop header
LB: loop body
LE: loop exit
PB: predicated region body
PF: predicated region fallthrough
CT: control target
= control target key end

     0   :  { %v181_v0 = vmov 0.0   ;;  %vm182_vm0 = vmmov 0   ;;  %v183_v2 = vmov 0   ;;  %vm74_vm1 = vcmask 1043456   ;;  %s231_s1 = inlined_call_operand.vmem [shape: bf16[72,128], index: 1, kind: input, shape index: {}]   ;;  %s232_s2 = inlined_call_operand.vmem [shape: f32[16,1], index: 2, kind: input, shape index: {}]   ;;  %s233_s0 = inlined_call_operand.vmem [shape: bf16[16,72], index: 0, kind: input, shape index: {}]   ;;  %s234_s3 = inlined_call_operand.vmem [shape: bf16[16,128], index: 3, kind: output, shape index: {}]  }
   0x1   :  { %157 = vmatprep.subr.bf16.mxu0 %v181_v0  ;;  %v175_v1 = vld [vmem:[%s231_s1] sm:$0xff]   ;;  %167 = vmatprep.mubr.msk.bf16.mxu0 %vm182_vm0, %v181_v0  ;;  %v176_v3 = vld [vmem:[%s231_s1 + $0x8] sm:$0xff]   ;;  %v177_v5 = vld [vmem:[%s231_s1 + $0x10] sm:$0xff]   ;;  %vm70_vm2 = vcmask 588800  }
   0x2   :  { %174 = vset.pattern.permute.xlu0 %v183_v2  ;;  %158 = vmatpush3.bf16.msra.mxu0 %v175_v1  ;;  %v26_v4 = vld [vmem:[%s232_s2] sm:$0xff]  ;;  %v27_v6 = vld [vmem:[%s232_s2 + $0x8] sm:$0xff]  ;;  %v178_v7 = vld [vmem:[%s231_s1 + $0x18] sm:$0xff]  }
   0x3   :  { %159 = vmatprep.subr.bf16.mxu0 %v181_v0  ;;  %30 = vperm.xlu0 %174, %v26_v4   ;;  %v179_v8 = vld [vmem:[%s231_s1 + $0x20] ss:$0 sps:$4 sm:$0xff]  }
   0x4   :  { %v76_v9 = vsel %vm74_vm1, %v179_v8, 0  ;;  %v180_v10 = vld [vmem:[%s233_s0] sm:$0xff]  }
   0x6   :  { %160 = vmatpush3.bf16.msra.mxu0 %v176_v3 }
   0x7   :  { %161 = vmatprep.subr.bf16.mxu0 %v181_v0  ;;  %35 = vperm.xlu0 %174, %v27_v6  }
   0xa   :  { %162 = vmatpush3.bf16.msra.mxu0 %v177_v5 }
   0xb   :  { %163 = vmatprep.subr.bf16.mxu0 %v181_v0 }
   0xe   :  { %164 = vmatpush3.bf16.msra.mxu0 %v178_v7 }
   0xf   :  { %165 = vmatprep.subr.bf16.mxu0 %v181_v0 }
  0x12   :  { %166 = vmatpush3.bf16.msra.mxu0 %v76_v9 }
  0x15   :  { %168 = vmatmul.mubr.msk.bf16.vlgmr.msra.gmra.mrb[0].mxu0 %vm70_vm2, %v180_v10 }
  0x82   :  { %v31_v11 = vpop.permute.xlu0 %30 }
  0x86   :  { %v36_v15 = vpop.permute.xlu0 %35 }
  0xe8   :  { %v112_v12 = vpop.f32.mrb[0].mxu0 }
  0xe9   :  { %v113_v13 = vadd.f32 %v112_v12, %v31_v11  ;;  %v169_v14 = vpop.f32.mrb[1].mxu0 }
  0xea   :  { %v115_v16 = vpop.f32.mrb[2].mxu0 }
  0xeb   :  { %v116_v17 = vadd.f32 %v115_v16, %v36_v15  ;;  %v170_v18 = vpop.f32.mrb[3].mxu0  ;;  %v119_v19 = vmax.f32 %v113_v13, 0.0 }
  0xed   :  { %v120_v20 = vmax.f32 %v116_v17, 0.0 }
  0xef   :  { %v149_v21 = vpack.c.bf16 %v120_v20, %v119_v19 }
  0xf1   :  { %150 = vst [vmem:[%s234_s3] sm:$0xff] %v149_v21  }

// kernel: generator_forward.10
= control target key start
LH: loop header
LB: loop body
LE: loop exit
PB: predicated region body
PF: predicated region fallthrough
CT: control target
= control target key end

     0   :  { %v287_v0 = vmov 0   ;;  %vm133_vm0 = vcmask 130048   ;;  %s365_s1 = inlined_call_operand.vmem [shape: bf16[144,128], index: 1, kind: input, shape index: {}]   ;;  %s366_s0 = inlined_call_operand.vmem [shape: bf16[32,144], index: 0, kind: input, shape index: {}]   ;;  %s367_s2 = inlined_call_operand.vmem [shape: f32[32,1], index: 2, kind: input, shape index: {}]   ;;  %s368_s3 = inlined_call_operand.vmem [shape: bf16[32,128], index: 3, kind: output, shape index: {}]  }
   0x1   :  { %140 = vmatprep.subr.bf16.mxu0 %v287_v0  ;;  %251 = vmatprep.subr.bf16.mxu1 %v287_v0  ;;  %v272_v1 = vld [vmem:[%s365_s1] sm:$0xff]   ;;  %v273_v2 = vld [vmem:[%s365_s1 + $0x8] sm:$0xff]   ;;  %v274_v3 = vld [vmem:[%s365_s1 + $0x10] sm:$0xff]  }
   0x2   :  { %271 = vset.pattern.permute.xlu1 %v287_v0  ;;  %270 = vset.pattern.permute.xlu0 %v287_v0  ;;  %v275_v4 = vld [vmem:[%s365_s1 + $0x18] sm:$0xff]   ;;  %v283_v5 = vld [vmem:[%s366_s0 + $0x4] ss:$8 sps:$4 sm:$0xff]   ;;  %v39_v7 = vld [vmem:[%s367_s2 + $0x10] sm:$0xff] }
   0x3   :  { %141 = vmatpush1.bf16.msra.mxu0 %v272_v1  ;;  %260 = vmatpush1.bf16.msra.mxu1 %v272_v1  ;;  %v286_v6 = vld [vmem:[%s366_s0 + $0x14] ss:$8 sps:$4 sm:$0xff]   ;;  %v37_v8 = vld [vmem:[%s367_s2] sm:$0xff]  ;;  %v38_v11 = vld [vmem:[%s367_s2 + $0x8] sm:$0xff] }
   0x4   :  { %142 = vmatprep.subr.bf16.mxu0 %v287_v0  ;;  %252 = vmatprep.subr.bf16.mxu1 %v287_v0  ;;  %v40_v9 = vld [vmem:[%s367_s2 + $0x18] sm:$0xff]  ;;  %v276_v10 = vld [vmem:[%s365_s1 + $0x20] sm:$0xff]   ;;  %v277_v12 = vld [vmem:[%s365_s1 + $0x28] sm:$0xff]  }
   0x5   :  { %230 = vmatprep.mubr.msk.bf16.mxu0 %vm133_vm0, %v283_v5  ;;  %53 = vperm.xlu1 %271, %v39_v7   ;;  %v278_v13 = vld [vmem:[%s365_s1 + $0x30] sm:$0xff]   ;;  %v279_v14 = vld [vmem:[%s365_s1 + $0x38] sm:$0xff]   ;;  %v280_v15 = vld [vmem:[%s365_s1 + $0x40] sm:$0xff]  }
   0x6   :  { %231 = vmatprep.mubr.msk.bf16.mxu1 %vm133_vm0, %v286_v6  ;;  %43 = vperm.xlu0 %270, %v37_v8   ;;  %v281_v16 = vld [vmem:[%s366_s0] ss:$8 sps:$4 sm:$0xff]   ;;  %v284_v17 = vld [vmem:[%s366_s0 + $0x10] ss:$8 sps:$4 sm:$0xff]  }
   0x7   :  { %143 = vmatpush1.bf16.msra.mxu0 %v273_v2  ;;  %261 = vmatpush1.bf16.msra.mxu1 %v273_v2 }
   0x8   :  { %144 = vmatprep.subr.bf16.mxu0 %v287_v0  ;;  %253 = vmatprep.subr.bf16.mxu1 %v287_v0 }
   0x9   :  { %58 = vperm.xlu1 %271, %v40_v9  }
   0xa   :  { %48 = vperm.xlu0 %270, %v38_v11  }
   0xb   :  { %145 = vmatpush1.bf16.msra.mxu0 %v274_v3  ;;  %262 = vmatpush1.bf16.msra.mxu1 %v274_v3 }
   0xc   :  { %146 = vmatprep.subr.bf16.mxu0 %v287_v0  ;;  %254 = vmatprep.subr.bf16.mxu1 %v287_v0 }
   0xf   :  { %147 = vmatpush1.bf16.msra.mxu0 %v275_v4  ;;  %263 = vmatpush1.bf16.msra.mxu1 %v275_v4 }
  0x10   :  { %148 = vmatprep.subr.bf16.mxu0 %v287_v0  ;;  %255 = vmatprep.subr.bf16.mxu1 %v287_v0 }
  0x13   :  { %149 = vmatpush1.bf16.msra.mxu0 %v276_v10  ;;  %264 = vmatpush1.bf16.msra.mxu1 %v276_v10 }
  0x14   :  { %150 = vmatprep.subr.bf16.mxu0 %v287_v0  ;;  %256 = vmatprep.subr.bf16.mxu1 %v287_v0 }
  0x17   :  { %151 = vmatpush1.bf16.msra.mxu0 %v277_v12  ;;  %265 = vmatpush1.bf16.msra.mxu1 %v277_v12 }
  0x18   :  { %152 = vmatprep.subr.bf16.mxu0 %v287_v0  ;;  %257 = vmatprep.subr.bf16.mxu1 %v287_v0 }
  0x1b   :  { %153 = vmatpush1.bf16.msra.mxu0 %v278_v13  ;;  %266 = vmatpush1.bf16.msra.mxu1 %v278_v13 }
  0x1c   :  { %154 = vmatprep.subr.bf16.mxu0 %v287_v0  ;;  %258 = vmatprep.subr.bf16.mxu1 %v287_v0 }
  0x1f   :  { %155 = vmatpush1.bf16.msra.mxu0 %v279_v14  ;;  %267 = vmatpush1.bf16.msra.mxu1 %v279_v14 }
  0x20   :  { %156 = vmatprep.subr.bf16.mxu0 %v287_v0  ;;  %259 = vmatprep.subr.bf16.mxu1 %v287_v0 }
  0x23   :  { %157 = vmatpush1.bf16.msra.mxu0 %v280_v15  ;;  %268 = vmatpush1.bf16.msra.mxu1 %v280_v15 }
  0x26   :  { %173 = vmatmul.mubr.bf16.vlgmr.msra.gmra.mrb[0].mxu0 %v281_v16  ;;  %181 = vmatmul.mubr.bf16.vlgmr.msra.gmra.mrb[0].mxu1 %v284_v17 }
  0x84   :  { %v54_v18 = vpop.permute.xlu1 %53 }
  0x85   :  { %v44_v19 = vpop.permute.xlu0 %43 }
  0x88   :  { %v59_v20 = vpop.permute.xlu1 %58 }
  0x89   :  { %v49_v21 = vpop.permute.xlu0 %48 }
  0xf9   :  { %v174_v22 = vpop.f32.mrb[0].mxu0  ;;  %v182_v23 = vpop.f32.mrb[0].mxu1 }
  0xfa   :  { %v175_v24 = vadd.f32 %v174_v22, %v44_v19  ;;  %v183_v25 = vadd.f32 %v182_v23, %v54_v18  ;;  %v176_v26 = vpop.f32.mrb[1].mxu0  ;;  %v184_v27 = vpop.f32.mrb[1].mxu1 }
  0xfb   :  { %v177_v28 = vpop.f32.mrb[2].mxu0  ;;  %v185_v29 = vpop.f32.mrb[2].mxu1 }
  0xfc   :  { %v178_v30 = vadd.f32 %v177_v28, %v49_v21  ;;  %v186_v31 = vadd.f32 %v185_v29, %v59_v20  ;;  %v179_v32 = vpop.f32.mrb[3].mxu0  ;;  %v187_v33 = vpop.f32.mrb[3].mxu1  ;;  %v189_v34 = vmax.f32 %v175_v24, 0.0  ;;  %v191_v35 = vmax.f32 %v183_v25, 0.0 }
  0xfe   :  { %v190_v36 = vmax.f32 %v178_v30, 0.0  ;;  %v192_v37 = vmax.f32 %v186_v31, 0.0 }
 0x100   :  { %v243_v38 = vpack.c.bf16 %v190_v36, %v189_v34  ;;  %v248_v39 = vpack.c.bf16 %v192_v37, %v191_v35 }
 0x102   :  { %244 = vst [vmem:[%s368_s3] sm:$0xff] %v243_v38   ;;  %250 = vst [vmem:[%s368_s3 + $0x8] sm:$0xff] %v248_v39  }

// kernel: generator_forward.11
= control target key start
LH: loop header
LB: loop body
LE: loop exit
PB: predicated region body
PF: predicated region fallthrough
CT: control target
= control target key end

     0   :  { %v662_v1 = vmov 0   ;;  %vm283_vm0 = vcmask 261120   ;;  %s813_s1 = inlined_call_operand.vmem [shape: bf16[288,128], index: 1, kind: input, shape index: {}]   ;;  %s814_s0 = inlined_call_operand.vmem [shape: bf16[64,288], index: 0, kind: input, shape index: {}]   ;;  %s815_s2 = inlined_call_operand.vmem [shape: f32[64,1], index: 2, kind: input, shape index: {}]   ;;  %s816_s3 = inlined_call_operand.vmem [shape: bf16[64,128], index: 3, kind: output, shape index: {}]  }
   0x1   :  { %v628_v0 = vld [vmem:[%s813_s1 + $0x40] sm:$0xff]   ;;  %627 = vset.pattern.permute.xlu1 %v662_v1  ;;  %626 = vset.pattern.permute.xlu0 %v662_v1  ;;  %v630_v3 = vld [vmem:[%s813_s1 + $0x48] sm:$0xff]   ;;  %v632_v5 = vld [vmem:[%s813_s1 + $0x50] sm:$0xff]  }
   0x2   :  { %v629_v2 = vld [vmem:[%s813_s1] sm:$0xff]   ;;  %551 = vmatprep.subr.bf16.mxu0 %v628_v0  ;;  %609 = vmatprep.subr.bf16.mxu1 %v628_v0  ;;  %v631_v4 = vld [vmem:[%s813_s1 + $0x8] sm:$0xff]   ;;  %v633_v6 = vld [vmem:[%s813_s1 + $0x10] sm:$0xff]  }
   0x3   :  { %552 = vmatpush3.bf16.msra.mxu0 %v629_v2  ;;  %617 = vmatpush3.bf16.msra.mxu1 %v629_v2  ;;  %v634_v7 = vld [vmem:[%s813_s1 + $0x58] sm:$0xff]   ;;  %v636_v9 = vld [vmem:[%s813_s1 + $0x60] sm:$0xff]   ;;  %v638_v11 = vld [vmem:[%s813_s1 + $0x68] sm:$0xff]  }
   0x4   :  { %553 = vmatprep.subr.bf16.mxu0 %v630_v3  ;;  %610 = vmatprep.subr.bf16.mxu1 %v630_v3  ;;  %v635_v8 = vld [vmem:[%s813_s1 + $0x18] sm:$0xff]   ;;  %v637_v10 = vld [vmem:[%s813_s1 + $0x20] sm:$0xff]   ;;  %v639_v14 = vld [vmem:[%s813_s1 + $0x28] sm:$0xff]  }
   0x5   :  { %v646_v12 = vld [vmem:[%s814_s0 + $0x4] ss:$12 sps:$4 sm:$0xff]   ;;  %v649_v13 = vld [vmem:[%s814_s0 + $0x4c] ss:$12 sps:$4 sm:$0xff]   ;;  %v647_v23 = vld [vmem:[%s814_s0 + $0x48] ss:$12 sps:$4 sm:$0xff]  }
   0x6   :  { %v640_v15 = vld [vmem:[%s813_s1 + $0x70] sm:$0xff]   ;;  %328 = vmatprep.mubr.bf16.mxu0 %v646_v12  ;;  %352 = vmatprep.mubr.bf16.mxu1 %v649_v13  ;;  %v642_v17 = vld [vmem:[%s813_s1 + $0x78] sm:$0xff]   ;;  %v67_v20 = vld [vmem:[%s815_s2] sm:$0xff] }
   0x7   :  { %554 = vmatpush3.bf16.msra.mxu0 %v631_v4  ;;  %618 = vmatpush3.bf16.msra.mxu1 %v631_v4  ;;  %v641_v16 = vld [vmem:[%s813_s1 + $0x30] sm:$0xff]   ;;  %v643_v18 = vld [vmem:[%s813_s1 + $0x38] sm:$0xff]   ;;  %v650_v21 = vld [vmem:[%s813_s1 + $0x80] sm:$0xff]  }
   0x8   :  { %555 = vmatprep.subr.bf16.mxu0 %v632_v5  ;;  %611 = vmatprep.subr.bf16.mxu1 %v632_v5  ;;  %v69_v19 = vld [vmem:[%s815_s2 + $0x10] sm:$0xff]  ;;  %v644_v22 = vld [vmem:[%s814_s0] ss:$12 sps:$4 sm:$0xff]   ;;  %v70_v24 = vld [vmem:[%s815_s2 + $0x18] sm:$0xff] }
   0x9   :  { %87 = vperm.xlu1 %627, %v69_v19   ;;  %77 = vperm.xlu0 %626, %v67_v20   ;;  %v68_v25 = vld [vmem:[%s815_s2 + $0x8] sm:$0xff]  ;;  %v71_v30 = vld [vmem:[%s815_s2 + $0x20] sm:$0xff]  ;;  %v74_v33 = vld [vmem:[%s815_s2 + $0x38] sm:$0xff] }
   0xa   :  { %v652_v26 = vld [vmem:[%s814_s0 + $0x1c] ss:$12 sps:$4 sm:$0xff]   ;;  %v655_v31 = vld [vmem:[%s814_s0 + $0x18] ss:$12 sps:$4 sm:$0xff]   ;;  %v656_v32 = vld [vmem:[%s814_s0 + $0x20] ss:$12 sps:$4 sm:$0xff]  }
   0xb   :  { %556 = vmatpush3.bf16.msra.mxu0 %v633_v6  ;;  %619 = vmatpush3.bf16.msra.mxu1 %v633_v6  ;;  %v651_v27 = vld [vmem:[%s813_s1 + $0x88] sm:$0xff]   ;;  %v73_v34 = vld [vmem:[%s815_s2 + $0x30] sm:$0xff]  ;;  %v659_v36 = vld [vmem:[%s814_s0 + $0x38] ss:$12 sps:$4 sm:$0xff]  }
   0xc   :  { %557 = vmatprep.subr.bf16.mxu0 %v634_v7  ;;  %612 = vmatprep.subr.bf16.mxu1 %v634_v7  ;;  %v654_v28 = vld [vmem:[%s814_s0 + $0x8] ss:$12 sps:$4 sm:$0xff]   ;;  %v660_v37 = vld [vmem:[%s814_s0 + $0x30] ss:$12 sps:$4 sm:$0xff]  }
   0xd   :  { %92 = vperm.xlu1 %627, %v70_v24   ;;  %82 = vperm.xlu0 %626, %v68_v25   ;;  %v72_v29 = vld [vmem:[%s815_s2 + $0x28] sm:$0xff]  ;;  %v657_v35 = vld [vmem:[%s814_s0 + $0x34] ss:$12 sps:$4 sm:$0xff]   ;;  %v661_v38 = vld [vmem:[%s814_s0 + $0x50] ss:$12 sps:$4 sm:$0xff]  }
   0xf   :  { %558 = vmatpush3.bf16.msra.mxu0 %v635_v8  ;;  %620 = vmatpush3.bf16.msra.mxu1 %v635_v8 }
  0x10   :  { %559 = vmatprep.subr.bf16.mxu0 %v636_v9  ;;  %613 = vmatprep.subr.bf16.mxu1 %v636_v9 }
  0x11   :  { %102 = vperm.xlu1 %627, %v72_v29   ;;  %97 = vperm.xlu0 %626, %v71_v30  }
  0x13   :  { %560 = vmatpush3.bf16.msra.mxu0 %v637_v10  ;;  %621 = vmatpush3.bf16.msra.mxu1 %v637_v10 }
  0x14   :  { %561 = vmatprep.subr.bf16.mxu0 %v638_v11  ;;  %614 = vmatprep.subr.bf16.mxu1 %v638_v11 }
  0x15   :  { %112 = vperm.xlu1 %627, %v74_v33   ;;  %107 = vperm.xlu0 %626, %v73_v34  }
  0x17   :  { %562 = vmatpush3.bf16.msra.mxu0 %v639_v14  ;;  %622 = vmatpush3.bf16.msra.mxu1 %v639_v14 }
  0x18   :  { %563 = vmatprep.subr.bf16.mxu0 %v640_v15  ;;  %615 = vmatprep.subr.bf16.mxu1 %v640_v15 }
  0x1b   :  { %564 = vmatpush3.bf16.msra.mxu0 %v641_v16  ;;  %623 = vmatpush3.bf16.msra.mxu1 %v641_v16 }
  0x1c   :  { %565 = vmatprep.subr.bf16.mxu0 %v642_v17  ;;  %616 = vmatprep.subr.bf16.mxu1 %v642_v17 }
  0x1f   :  { %566 = vmatpush3.bf16.msra.mxu0 %v643_v18  ;;  %624 = vmatpush3.bf16.msra.mxu1 %v643_v18 }
  0x20   :  { %597 = vmatprep.subr.bf16.mxu1 %v650_v21 }
  0x22   :  { %329 = vmatmul.mubr.bf16.vlgmr.msra.gmra.mrb[0].mxu0 %v644_v22  ;;  %353 = vmatmul.mubr.bf16.vlgmr.msra.gmra.mrb[0].mxu1 %v647_v23 }
  0x23   :  { %598 = vmatpush3.bf16.msra.mxu1 %v650_v21  ;;  %336 = vmatprep.mubr.bf16.mxu0 %v652_v26 }
  0x24   :  { %599 = vmatprep.subr.bf16.mxu1 %v651_v27  ;;  %601 = vmatprep.mubr.msk.bf16.mxu1 %vm283_vm0, %v654_v28 }
  0x27   :  { %600 = vmatpush3.bf16.msra.mxu1 %v651_v27 }
  0x2a   :  { %337 = vmatmul.mubr.bf16.gmra.mrb[4].mxu0 %v655_v31  ;;  %602 = vmatmul.mubr.msk.bf16.vlgmr.msra.gmra.mrb[4].mxu1 %vm283_vm0, %v656_v32 }
  0x2b   :  { %344 = vmatprep.mubr.bf16.mxu0 %v657_v35  ;;  %605 = vmatprep.mubr.msk.bf16.mxu1 %vm283_vm0, %v659_v36 }
  0x32   :  { %345 = vmatmul.mubr.bf16.gmra.mrb[8].mxu0 %v660_v37  ;;  %606 = vmatmul.mubr.msk.bf16.gmra.mrb[8].mxu1 %vm283_vm0, %v661_v38 }
  0x88   :  { %v88_v39 = vpop.permute.xlu1 %87  ;;  %v78_v40 = vpop.permute.xlu0 %77 }
  0x8c   :  { %v93_v41 = vpop.permute.xlu1 %92  ;;  %v83_v42 = vpop.permute.xlu0 %82 }
  0x90   :  { %v98_v55 = vpop.permute.xlu0 %97  ;;  %v103_v56 = vpop.permute.xlu1 %102 }
  0x94   :  { %v108_v5 = vpop.permute.xlu0 %107  ;;  %v113_v9 = vpop.permute.xlu1 %112 }
  0xf5   :  { %v567_v43 = vpop.f32.mrb[0].mxu0  ;;  %v585_v44 = vpop.f32.mrb[0].mxu1 }
  0xf6   :  { %v568_v45 = vpop.f32.mrb[1].mxu0  ;;  %v586_v46 = vpop.f32.mrb[1].mxu1 }
  0xf7   :  { %v569_v47 = vadd.f32 %v568_v45, %v567_v43  ;;  %v570_v48 = vpop.f32.mrb[2].mxu0  ;;  %v587_v49 = vadd.f32 %v586_v46, %v585_v44  ;;  %v588_v50 = vpop.f32.mrb[2].mxu1 }
  0xf8   :  { %v571_v51 = vpop.f32.mrb[3].mxu0  ;;  %v589_v52 = vpop.f32.mrb[3].mxu1 }
  0xf9   :  { %v572_v53 = vadd.f32 %v571_v51, %v570_v48  ;;  %v590_v54 = vadd.f32 %v589_v52, %v588_v50  ;;  %v331_v59 = vadd.f32 %v569_v47, %v78_v40  ;;  %v355_v14 = vadd.f32 %v587_v49, %v108_v5 }
  0xfb   :  { %v334_v2 = vadd.f32 %v572_v53, %v83_v42  ;;  %v358_v19 = vadd.f32 %v590_v54, %v113_v9 }
  0xfd   :  { %v573_v57 = vpop.f32.mrb[4].mxu0  ;;  %v603_v58 = vpop.f32.mrb[4].mxu1 }
  0xfe   :  { %v574_v60 = vpop.f32.mrb[5].mxu0  ;;  %v395_v61 = vpop.f32.mrb[5].mxu1 }
  0xff   :  { %v575_v62 = vadd.f32 %v574_v60, %v573_v57  ;;  %v396_v63 = vadd.f32 %v395_v61, %v331_v59  ;;  %v576_v0 = vpop.f32.mrb[6].mxu0  ;;  %v604_v1 = vpop.f32.mrb[6].mxu1 }
 0x100   :  { %v577_v3 = vpop.f32.mrb[7].mxu0  ;;  %v398_v4 = vpop.f32.mrb[7].mxu1 }
 0x101   :  { %v339_v6 = vadd.f32 %v575_v62, %v88_v39  ;;  %v578_v7 = vadd.f32 %v577_v3, %v576_v0  ;;  %v399_v8 = vadd.f32 %v398_v4, %v334_v2  ;;  %v426_v11 = vmax.f32 %v396_v63, 0.0 }
 0x103   :  { %v404_v10 = vadd.f32 %v603_v58, %v339_v6  ;;  %v342_v12 = vadd.f32 %v578_v7, %v93_v41  ;;  %v427_v13 = vmax.f32 %v399_v8, 0.0 }
 0x105   :  { %v407_v15 = vadd.f32 %v604_v1, %v342_v12  ;;  %v531_v16 = vpack.c.bf16 %v427_v13, %v426_v11  ;;  %v579_v17 = vpop.f32.mrb[8].mxu0  ;;  %v607_v18 = vpop.f32.mrb[8].mxu1  ;;  %v428_v23 = vmax.f32 %v404_v10, 0.0 }
 0x106   :  { %v420_v20 = vadd.f32 %v607_v18, %v355_v14  ;;  %v580_v21 = vpop.f32.mrb[9].mxu0  ;;  %v411_v22 = vpop.f32.mrb[9].mxu1 }
 0x107   :  { %v429_v24 = vmax.f32 %v407_v15, 0.0  ;;  %532 = vst [vmem:[%s816_s3] sm:$0xff] %v531_v16   ;;  %v581_v25 = vadd.f32 %v580_v21, %v579_v17  ;;  %v582_v26 = vpop.f32.mrb[10].mxu0  ;;  %v608_v27 = vpop.f32.mrb[10].mxu1 }
 0x108   :  { %v423_v28 = vadd.f32 %v608_v27, %v358_v19  ;;  %v583_v29 = vpop.f32.mrb[11].mxu0  ;;  %v414_v30 = vpop.f32.mrb[11].mxu1  ;;  %v432_v34 = vmax.f32 %v420_v20, 0.0 }
 0x109   :  { %v536_v31 = vpack.c.bf16 %v429_v24, %v428_v23  ;;  %v347_v32 = vadd.f32 %v581_v25, %v98_v55  ;;  %v584_v33 = vadd.f32 %v583_v29, %v582_v26 }
 0x10a   :  { %v433_v35 = vmax.f32 %v423_v28, 0.0 }
 0x10b   :  { %548 = vst [vmem:[%s816_s3 + $0x8] sm:$0xff] %v536_v31   ;;  %v412_v36 = vadd.f32 %v411_v22, %v347_v32  ;;  %v350_v37 = vadd.f32 %v584_v33, %v103_v56 }
 0x10c   :  { %v546_v38 = vpack.c.bf16 %v433_v35, %v432_v34 }
 0x10d   :  { %v415_v39 = vadd.f32 %v414_v30, %v350_v37  ;;  %v430_v40 = vmax.f32 %v412_v36, 0.0 }
 0x10e   :  { %550 = vst [vmem:[%s816_s3 + $0x18] sm:$0xff] %v546_v38  }
 0x10f   :  { %v431_v41 = vmax.f32 %v415_v39, 0.0 }
 0x111   :  { %v541_v42 = vpack.c.bf16 %v431_v41, %v430_v40 }
 0x113   :  { %549 = vst [vmem:[%s816_s3 + $0x10] sm:$0xff] %v541_v42  }

// kernel: generator_forward.12
= control target key start
LH: loop header
LB: loop body
LE: loop exit
PB: predicated region body
PF: predicated region fallthrough
CT: control target
= control target key end

     0   :  { %v765_v1 = vmov 0   ;;  %vm389_vm0 = vcmask 523264   ;;  %s944_s1 = inlined_call_operand.vmem [shape: bf16[576,128], index: 1, kind: input, shape index: {}]   ;;  %s945_s0 = inlined_call_operand.vmem [shape: bf16[32,576], index: 0, kind: input, shape index: {}]   ;;  %s946_s2 = inlined_call_operand.vmem [shape: f32[32,1], index: 2, kind: input, shape index: {}]   ;;  %s947_s3 = inlined_call_operand.vmem [shape: bf16[32,128], index: 3, kind: output, shape index: {}]  }
   0x1   :  { %v715_v0 = vld [vmem:[%s944_s1 + $0x40] sm:$0xff]   ;;  %713 = vset.pattern.permute.xlu0 %v765_v1  ;;  %714 = vset.pattern.permute.xlu1 %v765_v1  ;;  %v719_v5 = vld [vmem:[%s944_s1 + $0x48] sm:$0xff]   ;;  %v723_v9 = vld [vmem:[%s944_s1 + $0x50] sm:$0xff]  }
   0x2   :  { %v716_v2 = vld [vmem:[%s944_s1] sm:$0xff]   ;;  %638 = vmatprep.subr.bf16.mxu0 %v715_v0  ;;  %v720_v6 = vld [vmem:[%s944_s1 + $0x8] sm:$0xff]   ;;  %v724_v10 = vld [vmem:[%s944_s1 + $0x10] sm:$0xff]  }
   0x3   :  { %v717_v3 = vld [vmem:[%s944_s1 + $0xc0] sm:$0xff]   ;;  %639 = vmatpush3.bf16.msra.mxu0 %v716_v2  ;;  %v721_v7 = vld [vmem:[%s944_s1 + $0xc8] sm:$0xff]   ;;  %v725_v11 = vld [vmem:[%s944_s1 + $0xd0] sm:$0xff]  }
   0x4   :  { %v718_v4 = vld [vmem:[%s944_s1 + $0x80] sm:$0xff]   ;;  %666 = vmatprep.subr.bf16.mxu1 %v717_v3  ;;  %640 = vmatprep.subr.bf16.mxu0 %v719_v5  ;;  %v722_v8 = vld [vmem:[%s944_s1 + $0x88] sm:$0xff]   ;;  %v726_v12 = vld [vmem:[%s944_s1 + $0x90] sm:$0xff]  }
   0x5   :  { %667 = vmatpush3.bf16.msra.mxu1 %v718_v4  ;;  %v727_v13 = vld [vmem:[%s944_s1 + $0x58] sm:$0xff]   ;;  %v731_v17 = vld [vmem:[%s944_s1 + $0x60] sm:$0xff]   ;;  %v735_v21 = vld [vmem:[%s944_s1 + $0x68] sm:$0xff]  }
   0x6   :  { %668 = vmatprep.subr.bf16.mxu1 %v721_v7  ;;  %v728_v14 = vld [vmem:[%s944_s1 + $0x18] sm:$0xff]   ;;  %v732_v18 = vld [vmem:[%s944_s1 + $0x20] sm:$0xff]   ;;  %v736_v22 = vld [vmem:[%s944_s1 + $0x28] sm:$0xff]  }
   0x7   :  { %641 = vmatpush3.bf16.msra.mxu0 %v720_v6  ;;  %v729_v15 = vld [vmem:[%s944_s1 + $0xd8] sm:$0xff]   ;;  %v733_v19 = vld [vmem:[%s944_s1 + $0xe0] sm:$0xff]   ;;  %v737_v23 = vld [vmem:[%s944_s1 + $0xe8] sm:$0xff]  }
   0x8   :  { %642 = vmatprep.subr.bf16.mxu0 %v723_v9  ;;  %v730_v16 = vld [vmem:[%s944_s1 + $0x98] sm:$0xff]   ;;  %v734_v20 = vld [vmem:[%s944_s1 + $0xa0] sm:$0xff]   ;;  %v738_v24 = vld [vmem:[%s944_s1 + $0xa8] sm:$0xff]  }
   0x9   :  { %669 = vmatpush3.bf16.msra.mxu1 %v722_v8  ;;  %v739_v25 = vld [vmem:[%s944_s1 + $0x70] sm:$0xff]   ;;  %v743_v29 = vld [vmem:[%s944_s1 + $0x78] sm:$0xff]   ;;  %v750_v35 = vld [vmem:[%s944_s1 + $0x100] sm:$0xff]  }
   0xa   :  { %670 = vmatprep.subr.bf16.mxu1 %v725_v11  ;;  %v740_v26 = vld [vmem:[%s944_s1 + $0x30] sm:$0xff]   ;;  %v744_v30 = vld [vmem:[%s944_s1 + $0x38] sm:$0xff]   ;;  %v753_v37 = vld [vmem:[%s945_s0 + $0xc] ss:$20 sps:$4 sm:$0xff]  }
   0xb   :  { %643 = vmatpush3.bf16.msra.mxu0 %v724_v10  ;;  %v741_v27 = vld [vmem:[%s944_s1 + $0xf0] sm:$0xff]   ;;  %v745_v31 = vld [vmem:[%s944_s1 + $0xf8] sm:$0xff]   ;;  %v754_v38 = vld [vmem:[%s944_s1 + $0x108] sm:$0xff]   ;;  %477 = vmatprep.mubr.bf16.mxu1 %v753_v37 }
   0xc   :  { %644 = vmatprep.subr.bf16.mxu0 %v727_v13  ;;  %v742_v28 = vld [vmem:[%s944_s1 + $0xb0] sm:$0xff]   ;;  %v748_v33 = vld [vmem:[%s945_s0 + $0x4] ss:$20 sps:$4 sm:$0xff]   ;;  %v751_v36 = vld [vmem:[%s945_s0 + $0x8] ss:$20 sps:$4 sm:$0xff]  }
   0xd   :  { %671 = vmatpush3.bf16.msra.mxu1 %v726_v12  ;;  %v746_v32 = vld [vmem:[%s945_s0] ss:$20 sps:$4 sm:$0xff]   ;;  %v749_v34 = vld [vmem:[%s944_s1 + $0xb8] sm:$0xff]   ;;  %428 = vmatprep.mubr.bf16.mxu0 %v748_v33  ;;  %v761_v43 = vld [vmem:[%s945_s0 + $0x30] ss:$20 sps:$4 sm:$0xff]  }
   0xe   :  { %672 = vmatprep.subr.bf16.mxu1 %v729_v15  ;;  %v755_v39 = vld [vmem:[%s945_s0 + $0x2c] ss:$20 sps:$4 sm:$0xff]   ;;  %v757_v40 = vld [vmem:[%s945_s0 + $0x28] ss:$20 sps:$4 sm:$0xff]   ;;  %v758_v41 = vld [vmem:[%s944_s1 + $0x110] sm:$0xff]  }
   0xf   :  { %645 = vmatpush3.bf16.msra.mxu0 %v728_v14  ;;  %v759_v42 = vld [vmem:[%s945_s0 + $0x34] ss:$20 sps:$4 sm:$0xff]   ;;  %v762_v44 = vld [vmem:[%s944_s1 + $0x118] sm:$0xff]   ;;  %v763_v45 = vld [vmem:[%s945_s0 + $0x10] ss:$20 sps:$4 sm:$0xff]  }
  0x10   :  { %646 = vmatprep.subr.bf16.mxu0 %v731_v17  ;;  %v99_v46 = vld [vmem:[%s946_s2] sm:$0xff]  ;;  %v101_v47 = vld [vmem:[%s946_s2 + $0x10] sm:$0xff]  ;;  %v100_v48 = vld [vmem:[%s946_s2 + $0x8] sm:$0xff] }
  0x11   :  { %673 = vmatpush3.bf16.msra.mxu1 %v730_v16  ;;  %105 = vperm.xlu0 %713, %v99_v46   ;;  %v102_v49 = vld [vmem:[%s946_s2 + $0x18] sm:$0xff] }
  0x12   :  { %674 = vmatprep.subr.bf16.mxu1 %v733_v19  ;;  %115 = vperm.xlu1 %714, %v101_v47   ;;  %v764_v50 = vld [vmem:[%s945_s0 + $0x38] ss:$20 sps:$4 sm:$0xff]  }
  0x13   :  { %647 = vmatpush3.bf16.msra.mxu0 %v732_v18 }
  0x14   :  { %648 = vmatprep.subr.bf16.mxu0 %v735_v21 }
  0x15   :  { %675 = vmatpush3.bf16.msra.mxu1 %v734_v20  ;;  %110 = vperm.xlu0 %713, %v100_v48  }
  0x16   :  { %676 = vmatprep.subr.bf16.mxu1 %v737_v23  ;;  %120 = vperm.xlu1 %714, %v102_v49  }
  0x17   :  { %649 = vmatpush3.bf16.msra.mxu0 %v736_v22 }
  0x18   :  { %650 = vmatprep.subr.bf16.mxu0 %v739_v25 }
  0x19   :  { %677 = vmatpush3.bf16.msra.mxu1 %v738_v24 }
  0x1a   :  { %678 = vmatprep.subr.bf16.mxu1 %v741_v27 }
  0x1b   :  { %651 = vmatpush3.bf16.msra.mxu0 %v740_v26 }
  0x1c   :  { %652 = vmatprep.subr.bf16.mxu0 %v743_v29 }
  0x1d   :  { %679 = vmatpush3.bf16.msra.mxu1 %v742_v28 }
  0x1e   :  { %680 = vmatprep.subr.bf16.mxu1 %v745_v31 }
  0x1f   :  { %653 = vmatpush3.bf16.msra.mxu0 %v744_v30 }
  0x20   :  { %700 = vmatprep.subr.bf16.mxu0 %v750_v35 }
  0x21   :  { %681 = vmatpush3.bf16.msra.mxu1 %v749_v34 }
  0x22   :  { %429 = vmatmul.mubr.bf16.vlgmr.msra.gmra.mrb[0].mxu0 %v746_v32 }
  0x23   :  { %701 = vmatpush3.bf16.msra.mxu0 %v750_v35  ;;  %436 = vmatprep.mubr.bf16.mxu0 %v755_v39 }
  0x24   :  { %478 = vmatmul.mubr.bf16.vlgmr.msra.gmra.mrb[0].mxu1 %v751_v36  ;;  %702 = vmatprep.subr.bf16.mxu0 %v754_v38 }
  0x25   :  { %485 = vmatprep.mubr.bf16.mxu1 %v759_v42 }
  0x27   :  { %703 = vmatpush3.bf16.msra.mxu0 %v754_v38 }
  0x28   :  { %704 = vmatprep.subr.bf16.mxu0 %v758_v41 }
  0x2a   :  { %437 = vmatmul.mubr.bf16.gmra.mrb[4].mxu0 %v757_v40 }
  0x2b   :  { %708 = vmatprep.mubr.msk.bf16.mxu0 %vm389_vm0, %v763_v45  ;;  %705 = vmatpush3.bf16.msra.mxu0 %v758_v41 }
  0x2c   :  { %486 = vmatmul.mubr.bf16.gmra.mrb[4].mxu1 %v761_v43  ;;  %706 = vmatprep.subr.bf16.mxu0 %v762_v44 }
  0x2f   :  { %707 = vmatpush3.bf16.msra.mxu0 %v762_v44 }
  0x32   :  { %709 = vmatmul.mubr.msk.bf16.vlgmr.msra.gmra.mrb[8].mxu0 %vm389_vm0, %v764_v50 }
  0x90   :  { %v106_v51 = vpop.permute.xlu0 %105 }
  0x91   :  { %v116_v3 = vpop.permute.xlu1 %115 }
  0x94   :  { %v111_v56 = vpop.permute.xlu0 %110 }
  0x95   :  { %v121_v16 = vpop.permute.xlu1 %120 }
  0xf5   :  { %v654_v52 = vpop.f32.mrb[0].mxu0 }
  0xf6   :  { %v655_v53 = vpop.f32.mrb[1].mxu0 }
  0xf7   :  { %v656_v54 = vadd.f32 %v655_v53, %v654_v52  ;;  %v657_v55 = vpop.f32.mrb[2].mxu0  ;;  %v682_v57 = vpop.f32.mrb[0].mxu1 }
  0xf8   :  { %v658_v58 = vpop.f32.mrb[3].mxu0  ;;  %v683_v61 = vpop.f32.mrb[1].mxu1 }
  0xf9   :  { %v431_v59 = vadd.f32 %v656_v54, %v106_v51  ;;  %v659_v60 = vadd.f32 %v658_v58, %v657_v55  ;;  %v684_v62 = vadd.f32 %v683_v61, %v682_v57  ;;  %v685_v63 = vpop.f32.mrb[2].mxu1 }
  0xfa   :  { %v686_v1 = vpop.f32.mrb[3].mxu1 }
  0xfb   :  { %v434_v0 = vadd.f32 %v659_v60, %v111_v56  ;;  %v687_v2 = vadd.f32 %v686_v1, %v685_v63  ;;  %v480_v4 = vadd.f32 %v684_v62, %v431_v59 }
  0xfd   :  { %v660_v5 = vpop.f32.mrb[4].mxu0  ;;  %v483_v7 = vadd.f32 %v687_v2, %v434_v0 }
  0xfe   :  { %v661_v6 = vpop.f32.mrb[5].mxu0 }
  0xff   :  { %v662_v8 = vadd.f32 %v661_v6, %v660_v5  ;;  %v663_v9 = vpop.f32.mrb[6].mxu0  ;;  %v688_v10 = vpop.f32.mrb[4].mxu1 }
 0x100   :  { %v664_v11 = vpop.f32.mrb[7].mxu0  ;;  %v689_v14 = vpop.f32.mrb[5].mxu1 }
 0x101   :  { %v439_v12 = vadd.f32 %v662_v8, %v116_v3  ;;  %v665_v13 = vadd.f32 %v664_v11, %v663_v9  ;;  %v690_v15 = vadd.f32 %v689_v14, %v688_v10  ;;  %v691_v17 = vpop.f32.mrb[6].mxu1 }
 0x102   :  { %v692_v19 = vpop.f32.mrb[7].mxu1 }
 0x103   :  { %v442_v18 = vadd.f32 %v665_v13, %v121_v16  ;;  %v693_v20 = vadd.f32 %v692_v19, %v691_v17  ;;  %v488_v21 = vadd.f32 %v690_v15, %v439_v12 }
 0x105   :  { %v710_v22 = vpop.f32.mrb[8].mxu0  ;;  %v491_v23 = vadd.f32 %v693_v20, %v442_v18 }
 0x106   :  { %v537_v24 = vadd.f32 %v710_v22, %v488_v21  ;;  %v528_v25 = vpop.f32.mrb[9].mxu0 }
 0x107   :  { %v529_v26 = vadd.f32 %v528_v25, %v480_v4  ;;  %v711_v27 = vpop.f32.mrb[10].mxu0 }
 0x108   :  { %v540_v28 = vadd.f32 %v711_v27, %v491_v23  ;;  %v531_v29 = vpop.f32.mrb[11].mxu0  ;;  %v545_v31 = vmax.f32 %v537_v24, 0.0 }
 0x109   :  { %v532_v30 = vadd.f32 %v531_v29, %v483_v7  ;;  %v543_v33 = vmax.f32 %v529_v26, 0.0 }
 0x10a   :  { %v546_v32 = vmax.f32 %v540_v28, 0.0 }
 0x10b   :  { %v544_v34 = vmax.f32 %v532_v30, 0.0 }
 0x10c   :  { %v635_v35 = vpack.c.bf16 %v546_v32, %v545_v31 }
 0x10d   :  { %v630_v36 = vpack.c.bf16 %v544_v34, %v543_v33 }
 0x10e   :  { %637 = vst [vmem:[%s947_s3 + $0x8] sm:$0xff] %v635_v35  }
 0x10f   :  { %631 = vst [vmem:[%s947_s3] sm:$0xff] %v630_v36  }

// kernel: generator_forward.13
= control target key start
LH: loop header
LB: loop body
LE: loop exit
PB: predicated region body
PF: predicated region fallthrough
CT: control target
= control target key end

     0   :  { %v648_v1 = vmov 0   ;;  %v649_v34 = vmov 0.0   ;;  %vm650_vm0 = vmmov 0   ;;  %vm346_vm1 = vcmask 523264   ;;  %s803_s1 = inlined_call_operand.vmem [shape: bf16[576,128], index: 1, kind: input, shape index: {}]   ;;  %s804_s0 = inlined_call_operand.vmem [shape: bf16[16,576], index: 0, kind: input, shape index: {}]   ;;  %s805_s2 = inlined_call_operand.vmem [shape: f32[16,1], index: 2, kind: input, shape index: {}]   ;;  %s806_s3 = inlined_call_operand.vmem [shape: bf16[16,128], index: 3, kind: output, shape index: {}]  }
   0x1   :  { %v605_v0 = vld [vmem:[%s803_s1 + $0x40] sm:$0xff]   ;;  %604 = vset.pattern.permute.xlu0 %v648_v1  ;;  %v609_v5 = vld [vmem:[%s803_s1 + $0x48] sm:$0xff]   ;;  %v613_v9 = vld [vmem:[%s803_s1 + $0x50] sm:$0xff]  }
   0x2   :  { %v606_v2 = vld [vmem:[%s803_s1] sm:$0xff]   ;;  %540 = vmatprep.subr.bf16.mxu0 %v605_v0  ;;  %v610_v6 = vld [vmem:[%s803_s1 + $0x8] sm:$0xff]   ;;  %v614_v10 = vld [vmem:[%s803_s1 + $0x10] sm:$0xff]  }
   0x3   :  { %v607_v3 = vld [vmem:[%s803_s1 + $0xc0] sm:$0xff]   ;;  %541 = vmatpush3.bf16.msra.mxu0 %v606_v2  ;;  %v611_v7 = vld [vmem:[%s803_s1 + $0xc8] sm:$0xff]   ;;  %v615_v11 = vld [vmem:[%s803_s1 + $0xd0] sm:$0xff]  }
   0x4   :  { %v608_v4 = vld [vmem:[%s803_s1 + $0x80] sm:$0xff]   ;;  %562 = vmatprep.subr.bf16.mxu1 %v607_v3  ;;  %542 = vmatprep.subr.bf16.mxu0 %v609_v5  ;;  %v612_v8 = vld [vmem:[%s803_s1 + $0x88] sm:$0xff]   ;;  %v616_v12 = vld [vmem:[%s803_s1 + $0x90] sm:$0xff]  }
   0x5   :  { %563 = vmatpush3.bf16.msra.mxu1 %v608_v4  ;;  %v617_v13 = vld [vmem:[%s803_s1 + $0x58] sm:$0xff]   ;;  %v621_v17 = vld [vmem:[%s803_s1 + $0x60] sm:$0xff]   ;;  %v625_v21 = vld [vmem:[%s803_s1 + $0x68] sm:$0xff]  }
   0x6   :  { %564 = vmatprep.subr.bf16.mxu1 %v611_v7  ;;  %v618_v14 = vld [vmem:[%s803_s1 + $0x18] sm:$0xff]   ;;  %v622_v18 = vld [vmem:[%s803_s1 + $0x20] sm:$0xff]   ;;  %v626_v22 = vld [vmem:[%s803_s1 + $0x28] sm:$0xff]  }
   0x7   :  { %543 = vmatpush3.bf16.msra.mxu0 %v610_v6  ;;  %v619_v15 = vld [vmem:[%s803_s1 + $0xd8] sm:$0xff]   ;;  %v623_v19 = vld [vmem:[%s803_s1 + $0xe0] sm:$0xff]   ;;  %v627_v23 = vld [vmem:[%s803_s1 + $0xe8] sm:$0xff]  }
   0x8   :  { %544 = vmatprep.subr.bf16.mxu0 %v613_v9  ;;  %v620_v16 = vld [vmem:[%s803_s1 + $0x98] sm:$0xff]   ;;  %v624_v20 = vld [vmem:[%s803_s1 + $0xa0] sm:$0xff]   ;;  %v628_v24 = vld [vmem:[%s803_s1 + $0xa8] sm:$0xff]  }
   0x9   :  { %565 = vmatpush3.bf16.msra.mxu1 %v612_v8  ;;  %v629_v25 = vld [vmem:[%s803_s1 + $0x70] sm:$0xff]   ;;  %v633_v29 = vld [vmem:[%s803_s1 + $0x78] sm:$0xff]   ;;  %v642_v37 = vld [vmem:[%s804_s0 + $0xc] ss:$20 sps:$4 sm:$0xff]  }
   0xa   :  { %566 = vmatprep.subr.bf16.mxu1 %v615_v11  ;;  %v630_v26 = vld [vmem:[%s803_s1 + $0x30] sm:$0xff]   ;;  %v634_v30 = vld [vmem:[%s803_s1 + $0x38] sm:$0xff]   ;;  %v643_v38 = vld [vmem:[%s803_s1 + $0x100] sm:$0xff]   ;;  %423 = vmatprep.mubr.bf16.mxu1 %v642_v37 }
   0xb   :  { %545 = vmatpush3.bf16.msra.mxu0 %v614_v10  ;;  %v631_v27 = vld [vmem:[%s803_s1 + $0xf0] sm:$0xff]   ;;  %v635_v31 = vld [vmem:[%s803_s1 + $0xf8] sm:$0xff]   ;;  %v644_v39 = vld [vmem:[%s803_s1 + $0x108] sm:$0xff]  }
   0xc   :  { %546 = vmatprep.subr.bf16.mxu0 %v617_v13  ;;  %v632_v28 = vld [vmem:[%s803_s1 + $0xb0] sm:$0xff]   ;;  %v638_v33 = vld [vmem:[%s804_s0 + $0x4] ss:$20 sps:$4 sm:$0xff]   ;;  %v640_v36 = vld [vmem:[%s804_s0 + $0x8] ss:$20 sps:$4 sm:$0xff]  }
   0xd   :  { %567 = vmatpush3.bf16.msra.mxu1 %v616_v12  ;;  %v636_v32 = vld [vmem:[%s804_s0] ss:$20 sps:$4 sm:$0xff]   ;;  %v639_v35 = vld [vmem:[%s803_s1 + $0xb8] sm:$0xff]   ;;  %382 = vmatprep.mubr.bf16.mxu0 %v638_v33  ;;  %v94_v42 = vld [vmem:[%s805_s2 + $0x8] sm:$0xff] }
   0xe   :  { %568 = vmatprep.subr.bf16.mxu1 %v619_v15  ;;  %v93_v40 = vld [vmem:[%s805_s2] sm:$0xff]  ;;  %v645_v41 = vld [vmem:[%s803_s1 + $0x110] sm:$0xff]   ;;  %v646_v43 = vld [vmem:[%s803_s1 + $0x118] sm:$0xff]  }
   0xf   :  { %547 = vmatpush3.bf16.msra.mxu0 %v618_v14  ;;  %97 = vperm.xlu0 %604, %v93_v40   ;;  %v647_v44 = vld [vmem:[%s804_s0 + $0x10] ss:$20 sps:$4 sm:$0xff]  }
  0x10   :  { %548 = vmatprep.subr.bf16.mxu0 %v621_v17 }
  0x11   :  { %569 = vmatpush3.bf16.msra.mxu1 %v620_v16 }
  0x12   :  { %570 = vmatprep.subr.bf16.mxu1 %v623_v19 }
  0x13   :  { %549 = vmatpush3.bf16.msra.mxu0 %v622_v18  ;;  %102 = vperm.xlu0 %604, %v94_v42  }
  0x14   :  { %550 = vmatprep.subr.bf16.mxu0 %v625_v21 }
  0x15   :  { %571 = vmatpush3.bf16.msra.mxu1 %v624_v20 }
  0x16   :  { %572 = vmatprep.subr.bf16.mxu1 %v627_v23 }
  0x17   :  { %551 = vmatpush3.bf16.msra.mxu0 %v626_v22 }
  0x18   :  { %552 = vmatprep.subr.bf16.mxu0 %v629_v25 }
  0x19   :  { %573 = vmatpush3.bf16.msra.mxu1 %v628_v24 }
  0x1a   :  { %574 = vmatprep.subr.bf16.mxu1 %v631_v27 }
  0x1b   :  { %553 = vmatpush3.bf16.msra.mxu0 %v630_v26 }
  0x1c   :  { %554 = vmatprep.subr.bf16.mxu0 %v633_v29 }
  0x1d   :  { %575 = vmatpush3.bf16.msra.mxu1 %v632_v28 }
  0x1e   :  { %576 = vmatprep.subr.bf16.mxu1 %v635_v31 }
  0x1f   :  { %555 = vmatpush3.bf16.msra.mxu0 %v634_v30 }
  0x20   :  { %589 = vmatprep.subr.bf16.mxu0 %v649_v34 }
  0x21   :  { %577 = vmatpush3.bf16.msra.mxu1 %v639_v35 }
  0x22   :  { %383 = vmatmul.mubr.bf16.vlgmr.msra.gmra.mrb[0].mxu0 %v636_v32 }
  0x23   :  { %597 = vmatprep.mubr.msk.bf16.mxu0 %vm650_vm0, %v649_v34  ;;  %590 = vmatpush3.bf16.msra.mxu0 %v643_v38 }
  0x24   :  { %424 = vmatmul.mubr.bf16.vlgmr.msra.gmra.mrb[0].mxu1 %v640_v36  ;;  %591 = vmatprep.subr.bf16.mxu0 %v649_v34 }
  0x27   :  { %592 = vmatpush3.bf16.msra.mxu0 %v644_v39 }
  0x28   :  { %593 = vmatprep.subr.bf16.mxu0 %v649_v34 }
  0x2b   :  { %594 = vmatpush3.bf16.msra.mxu0 %v645_v41 }
  0x2c   :  { %595 = vmatprep.subr.bf16.mxu0 %v649_v34 }
  0x2f   :  { %596 = vmatpush3.bf16.msra.mxu0 %v646_v43 }
  0x32   :  { %598 = vmatmul.mubr.msk.bf16.vlgmr.msra.gmra.mrb[4].mxu0 %vm346_vm1, %v647_v44 }
  0x8e   :  { %v98_v45 = vpop.permute.xlu0 %97 }
  0x92   :  { %v103_v50 = vpop.permute.xlu0 %102 }
  0xf5   :  { %v556_v46 = vpop.f32.mrb[0].mxu0 }
  0xf6   :  { %v557_v47 = vpop.f32.mrb[1].mxu0 }
  0xf7   :  { %v558_v48 = vadd.f32 %v557_v47, %v556_v46  ;;  %v559_v49 = vpop.f32.mrb[2].mxu0  ;;  %v578_v51 = vpop.f32.mrb[0].mxu1 }
  0xf8   :  { %v560_v52 = vpop.f32.mrb[3].mxu0  ;;  %v579_v55 = vpop.f32.mrb[1].mxu1 }
  0xf9   :  { %v385_v53 = vadd.f32 %v558_v48, %v98_v45  ;;  %v561_v54 = vadd.f32 %v560_v52, %v559_v49  ;;  %v580_v56 = vadd.f32 %v579_v55, %v578_v51  ;;  %v581_v57 = vpop.f32.mrb[2].mxu1 }
  0xfa   :  { %v582_v59 = vpop.f32.mrb[3].mxu1 }
  0xfb   :  { %v388_v58 = vadd.f32 %v561_v54, %v103_v50  ;;  %v583_v60 = vadd.f32 %v582_v59, %v581_v57  ;;  %v426_v61 = vadd.f32 %v580_v56, %v385_v53 }
  0xfd   :  { %v429_v62 = vadd.f32 %v583_v60, %v388_v58 }
 0x105   :  { %v466_v63 = vpop.f32.mrb[4].mxu0 }
 0x106   :  { %v467_v0 = vadd.f32 %v466_v63, %v426_v61  ;;  %v599_v1 = vpop.f32.mrb[5].mxu0 }
 0x107   :  { %v469_v2 = vpop.f32.mrb[6].mxu0 }
 0x108   :  { %v470_v3 = vadd.f32 %v469_v2, %v429_v62  ;;  %v600_v4 = vpop.f32.mrb[7].mxu0  ;;  %v473_v5 = vmax.f32 %v467_v0, 0.0 }
 0x10a   :  { %v474_v6 = vmax.f32 %v470_v3, 0.0 }
 0x10c   :  { %v538_v7 = vpack.c.bf16 %v474_v6, %v473_v5 }
 0x10e   :  { %539 = vst [vmem:[%s806_s3] sm:$0xff] %v538_v7  }

// kernel: generator_forward.14
= control target key start
LH: loop header
LB: loop body
LE: loop exit
PB: predicated region body
PF: predicated region fallthrough
CT: control target
= control target key end

     0   :  { %s930_s12 = smov 0   ;;  %s932_s13 = smov 0   ;;  %s1111_s0 = inlined_call_operand.vmem [shape: bf16[8,288], index: 0, kind: input, shape index: {}]   ;;  %s1112_s1 = inlined_call_operand.vmem [shape: bf16[288,512], index: 1, kind: input, shape index: {}]   ;;  %s1113_s2 = inlined_call_operand.vmem [shape: f32[8,1], index: 2, kind: input, shape index: {}]   ;;  %s1114_s3 = inlined_call_operand.vmem [shape: bf16[8,512], index: 3, kind: output, shape index: {}]  }
   0x1   :  { %s934_s14 = smov 0  }
   0x2 LB: > { %s742_s15 = sadd.s32 4294967295, %s907_s14   ;;  %s947_s16 = sadd.s32 1, %s907_s14   ;;  %s907_s14 = sphi %s934_s14, %s1117_s14   ;;  %s903_s13 = sphi %s932_s13, %s1116_s13   ;;  %s899_s12 = sphi %s930_s12, %s1115_s12  }
   0x3   : > { %s38_s17 = ssub.s32 %s907_s14, %s947_s16  ;;  %s41_s18 = sadd.s32 1, %s903_s13 }
   0x4   : > { %p39_p0 = scmp.eq.s32.totalorder %s38_s17, 0  ;;  %p48_p1 = scmp.ne.s32.totalorder %s903_s13, %s899_s12 }
   0x5   : > { %p49_p2 = scmp.eq.s32.totalorder %s907_s14, 0  ;;  %p745_p4 = scmp.ge.s32.totalorder %s907_s14, 2 }
   0x6   : > { %s956_s19 = scalar_select %p39_p0, %s903_s13, %s41_s18  }
   0x7   : > { %p50_p3 = por %p49_p2, %p48_p1  ;;  %127 = sbr.rel (%p745_p4) target bundleno = 36 (0x24), region = 24 }
   0xe   : > { %130 = sbr.rel (!%p50_p3) target bundleno = 36 (0x24), region = 28  ;;  %s132_s20 = sand.u32 (%p50_p3), 1, %s903_s13  }
   0xf   : > { %s794_s21 = sshll.u32 (%p50_p3), %s907_s14, 3  ;;  %s800_s22 = smul.u32 (%p50_p3), 288, %s132_s20 }
  0x10   : > { %s964_s25 = scalar_lea.vmem (%p50_p3), %s1112_s1, %s794_s21 }
  0x11   : > { %v235_v0 = vld [vmem:[%s964_s25] sm:$0xff] (%p50_p3)  ;;  %v237_v1 = vld [vmem:[%s964_s25 + $0x10] sm:$0xff] (%p50_p3)  ;;  %s972_s26 = scalar_lea.vmem (%p50_p3), [#allocation2], %s800_s22 }
  0x12   : > { %v239_v2 = vld [vmem:[%s964_s25 + $0x20] sm:$0xff] (%p50_p3)  ;;  %v241_v3 = vld [vmem:[%s964_s25 + $0x30] sm:$0xff] (%p50_p3)  ;;  %236 = vst [vmem:[%s972_s26] sm:$0xff] (%p50_p3), %v235_v0  ;;  %238 = vst [vmem:[%s972_s26 + $0x8] sm:$0xff] (%p50_p3), %v237_v1 }
  0x13   : > { %v243_v4 = vld [vmem:[%s964_s25 + $0x40] sm:$0xff] (%p50_p3)  ;;  %v245_v5 = vld [vmem:[%s964_s25 + $0x50] sm:$0xff] (%p50_p3)  ;;  %240 = vst [vmem:[%s972_s26 + $0x10] sm:$0xff] (%p50_p3), %v239_v2  ;;  %242 = vst [vmem:[%s972_s26 + $0x18] sm:$0xff] (%p50_p3), %v241_v3 }
  0x14   : > { %244 = vst [vmem:[%s972_s26 + $0x20] sm:$0xff] (%p50_p3), %v243_v4  ;;  %246 = vst [vmem:[%s972_s26 + $0x28] sm:$0xff] (%p50_p3), %v245_v5  ;;  %v247_v6 = vld [vmem:[%s964_s25 + $0x60] sm:$0xff] (%p50_p3)  ;;  %v249_v7 = vld [vmem:[%s964_s25 + $0x70] sm:$0xff] (%p50_p3) }
  0x15   : > { %v251_v8 = vld [vmem:[%s964_s25 + $0x80] sm:$0xff]  ;;  %248 = vst [vmem:[%s972_s26 + $0x30] sm:$0xff] %v247_v6  ;;  %250 = vst [vmem:[%s972_s26 + $0x38] sm:$0xff] %v249_v7  ;;  %v253_v9 = vld [vmem:[%s964_s25 + $0x90] sm:$0xff] }
  0x16   : > { %252 = vst [vmem:[%s972_s26 + $0x40] sm:$0xff] %v251_v8  ;;  %v255_v10 = vld [vmem:[%s964_s25 + $0xa0] sm:$0xff]  ;;  %v257_v11 = vld [vmem:[%s964_s25 + $0xb0] sm:$0xff]  ;;  %254 = vst [vmem:[%s972_s26 + $0x48] sm:$0xff] %v253_v9 }
  0x17   : > { %256 = vst [vmem:[%s972_s26 + $0x50] sm:$0xff] %v255_v10  ;;  %258 = vst [vmem:[%s972_s26 + $0x58] sm:$0xff] %v257_v11  ;;  %v259_v12 = vld [vmem:[%s964_s25 + $0xc0] sm:$0xff]  ;;  %v261_v13 = vld [vmem:[%s964_s25 + $0xd0] sm:$0xff] }
  0x18   : > { %v263_v14 = vld [vmem:[%s964_s25 + $0xe0] sm:$0xff]  ;;  %260 = vst [vmem:[%s972_s26 + $0x60] sm:$0xff] %v259_v12  ;;  %262 = vst [vmem:[%s972_s26 + $0x68] sm:$0xff] %v261_v13  ;;  %v265_v15 = vld [vmem:[%s964_s25 + $0xf0] sm:$0xff] }
  0x19   : > { %264 = vst [vmem:[%s972_s26 + $0x70] sm:$0xff] %v263_v14  ;;  %v267_v16 = vld [vmem:[%s964_s25 + $0x100] sm:$0xff]  ;;  %v269_v17 = vld [vmem:[%s964_s25 + $0x110] sm:$0xff]  ;;  %266 = vst [vmem:[%s972_s26 + $0x78] sm:$0xff] %v265_v15 }
  0x1a   : > { %268 = vst [vmem:[%s972_s26 + $0x80] sm:$0xff] %v267_v16  ;;  %270 = vst [vmem:[%s972_s26 + $0x88] sm:$0xff] %v269_v17  ;;  %v271_v18 = vld [vmem:[%s964_s25 + $0x120] sm:$0xff]  ;;  %v273_v19 = vld [vmem:[%s964_s25 + $0x130] sm:$0xff] }
  0x1b   : > { %v275_v20 = vld [vmem:[%s964_s25 + $0x140] sm:$0xff]  ;;  %272 = vst [vmem:[%s972_s26 + $0x90] sm:$0xff] %v271_v18  ;;  %274 = vst [vmem:[%s972_s26 + $0x98] sm:$0xff] %v273_v19  ;;  %v277_v21 = vld [vmem:[%s964_s25 + $0x150] sm:$0xff] }
  0x1c   : > { %276 = vst [vmem:[%s972_s26 + $0xa0] sm:$0xff] %v275_v20  ;;  %v279_v22 = vld [vmem:[%s964_s25 + $0x160] sm:$0xff]  ;;  %v281_v23 = vld [vmem:[%s964_s25 + $0x170] sm:$0xff]  ;;  %278 = vst [vmem:[%s972_s26 + $0xa8] sm:$0xff] %v277_v21 }
  0x1d   : > { %280 = vst [vmem:[%s972_s26 + $0xb0] sm:$0xff] %v279_v22  ;;  %282 = vst [vmem:[%s972_s26 + $0xb8] sm:$0xff] %v281_v23  ;;  %v283_v24 = vld [vmem:[%s964_s25 + $0x180] sm:$0xff]  ;;  %v285_v25 = vld [vmem:[%s964_s25 + $0x190] sm:$0xff] }
  0x1e   : > { %v287_v26 = vld [vmem:[%s964_s25 + $0x1a0] sm:$0xff]  ;;  %284 = vst [vmem:[%s972_s26 + $0xc0] sm:$0xff] %v283_v24  ;;  %286 = vst [vmem:[%s972_s26 + $0xc8] sm:$0xff] %v285_v25  ;;  %v289_v27 = vld [vmem:[%s964_s25 + $0x1b0] sm:$0xff] }
  0x1f   : > { %288 = vst [vmem:[%s972_s26 + $0xd0] sm:$0xff] %v287_v26  ;;  %v291_v28 = vld [vmem:[%s964_s25 + $0x1c0] sm:$0xff]  ;;  %v293_v29 = vld [vmem:[%s964_s25 + $0x1d0] sm:$0xff]  ;;  %290 = vst [vmem:[%s972_s26 + $0xd8] sm:$0xff] %v289_v27 }
  0x20   : > { %292 = vst [vmem:[%s972_s26 + $0xe0] sm:$0xff] %v291_v28  ;;  %294 = vst [vmem:[%s972_s26 + $0xe8] sm:$0xff] %v293_v29  ;;  %v295_v30 = vld [vmem:[%s964_s25 + $0x1e0] sm:$0xff]  ;;  %v297_v31 = vld [vmem:[%s964_s25 + $0x1f0] sm:$0xff] }
  0x21   : > { %v299_v32 = vld [vmem:[%s964_s25 + $0x200] sm:$0xff]  ;;  %296 = vst [vmem:[%s972_s26 + $0xf0] sm:$0xff] %v295_v30  ;;  %298 = vst [vmem:[%s972_s26 + $0xf8] sm:$0xff] %v297_v31  ;;  %v301_v33 = vld [vmem:[%s964_s25 + $0x210] sm:$0xff] }
  0x22   : > { %300 = vst [vmem:[%s972_s26 + $0x100] sm:$0xff] %v299_v32  ;;  %v303_v34 = vld [vmem:[%s964_s25 + $0x220] sm:$0xff]  ;;  %v305_v35 = vld [vmem:[%s964_s25 + $0x230] sm:$0xff]  ;;  %302 = vst [vmem:[%s972_s26 + $0x108] sm:$0xff] %v301_v33 }
  0x23   : > { %304 = vst [vmem:[%s972_s26 + $0x110] sm:$0xff] %v303_v34  ;;  %306 = vst [vmem:[%s972_s26 + $0x118] sm:$0xff] %v305_v35 }
  0x24 PF: > { %p748_p5 = scmp.ge.s32.totalorder %s907_s14, 1  ;;  %p311_p6 = scmp.lt.s32.totalorder %s907_s14, 3 }
  0x26   : > { %p312_p7 = pnand %p748_p5, %p311_p6 }
  0x27   : > { %s318_s27 = sand.u32 (!%p312_p7), 1, %s899_s12   ;;  %v1046_v36 = vld [vmem:[%s1111_s0] sm:$0xff] (!%p312_p7)  ;;  %v909_v37 = vmov (!%p312_p7), 0   ;;  %v884_v59 = vld [vmem:[%s1111_s0 + $0x8] ss:$0 sps:$4 sm:$0xff] (!%p312_p7)   ;;  %vm583_vm0 = vcmask (!%p312_p7), 261120  }
  0x28   : > { %315 = sbr.rel (%p312_p7) target bundleno = 331 (0x14b), region = 66  ;;  %660 = vmatprep.mubr.bf16.mxu0 (!%p312_p7), %v909_v37  ;;  %v752_v38 = vcombine.high (!%p312_p7), %v1046_v36, %v1046_v36  ;;  %827 = vset.pattern.permute.xlu0 (!%p312_p7), %v909_v37  ;;  %v387_v39 = vld [vmem:[%s1113_s2] sm:$0xff] (!%p312_p7)  ;;  %v751_v13 = vcombine.low (!%p312_p7), %v1046_v36, %v1046_v36  ;;  %s749_s9 = sshll.u32 (!%p312_p7), %s742_s15, 1 }
  0x29   : > { %s801_s30 = smul.u32 (!%p312_p7), 288, %s318_s27  ;;  %390 = vperm.xlu0 (!%p312_p7), %827, %v387_v39   ;;  %p343_p8 = scmp.lt.s32.totalorder (!%p312_p7), %s749_s9, 3 }
  0x2a   : > { %619 = vmatprep.mubr.bf16.mxu1 (!%p312_p7), %v752_v38 }
  0x2b   : > { %s1053_s6 = scalar_lea.vmem (!%p312_p7), [#allocation2], %s801_s30 }
  0x2c   : > { %v828_v40 = vld [vmem:[%s1053_s6 + $0x4] ss:$8 sps:$4 sm:$0xff] (!%p312_p7)   ;;  %v830_v41 = vld [vmem:[%s1053_s6] ss:$8 sps:$4 sm:$0xff] (!%p312_p7)   ;;  %v831_v42 = vld [vmem:[%s1053_s6 + $0x14] ss:$8 sps:$4 sm:$0xff] (!%p312_p7)  }
  0x2d   : > { %587 = vmatprep.subr.bf16.mxu1 (!%p312_p7), %v828_v40  ;;  %v833_v43 = vld [vmem:[%s1053_s6 + $0x10] ss:$8 sps:$4 sm:$0xff] (!%p312_p7)   ;;  %v834_v44 = vld [vmem:[%s1053_s6 + $0x24] ss:$8 sps:$4 sm:$0xff] (!%p312_p7)   ;;  %v836_v45 = vld [vmem:[%s1053_s6 + $0x20] ss:$8 sps:$4 sm:$0xff] (!%p312_p7)  }
  0x2e   : > { %588 = vmatpush1.bf16.msra.mxu1 (!%p312_p7), %v830_v41  ;;  %v837_v46 = vld [vmem:[%s1053_s6 + $0x34] ss:$8 sps:$4 sm:$0xff] (!%p312_p7)   ;;  %v839_v47 = vld [vmem:[%s1053_s6 + $0x30] ss:$8 sps:$4 sm:$0xff] (!%p312_p7)   ;;  %v840_v48 = vld [vmem:[%s1053_s6 + $0x44] ss:$8 sps:$4 sm:$0xff] (!%p312_p7)  }
  0x2f   : > { %589 = vmatprep.subr.bf16.mxu1 %v831_v42  ;;  %v842_v49 = vld [vmem:[%s1053_s6 + $0x40] ss:$8 sps:$4 sm:$0xff]   ;;  %v843_v50 = vld [vmem:[%s1053_s6 + $0x54] ss:$8 sps:$4 sm:$0xff]   ;;  %v845_v51 = vld [vmem:[%s1053_s6 + $0x50] ss:$8 sps:$4 sm:$0xff]  }
  0x30   : > { %v870_v52 = vld [vmem:[%s1053_s6 + $0x104] ss:$8 sps:$4 sm:$0xff]   ;;  %v874_v54 = vld [vmem:[%s1053_s6 + $0x100] ss:$8 sps:$4 sm:$0xff]   ;;  %v876_v55 = vld [vmem:[%s1053_s6 + $0x114] ss:$8 sps:$4 sm:$0xff]  }
  0x31   : > { %v846_v53 = vld [vmem:[%s1053_s6 + $0x64] ss:$8 sps:$4 sm:$0xff]   ;;  %628 = vmatprep.subr.bf16.mxu0 %v870_v52  ;;  %v848_v56 = vld [vmem:[%s1053_s6 + $0x60] ss:$8 sps:$4 sm:$0xff]   ;;  %v880_v57 = vld [vmem:[%s1053_s6 + $0x110] ss:$8 sps:$4 sm:$0xff]  }
  0x32   : > { %590 = vmatpush1.bf16.msra.mxu1 %v833_v43  ;;  %629 = vmatpush1.bf16.msra.mxu0 %v874_v54  ;;  %v849_v58 = vld [vmem:[%s1053_s6 + $0x74] ss:$8 sps:$4 sm:$0xff]   ;;  %v851_v60 = vld [vmem:[%s1053_s6 + $0x70] ss:$8 sps:$4 sm:$0xff]   ;;  %v852_v61 = vld [vmem:[%s1053_s6 + $0x84] ss:$8 sps:$4 sm:$0xff]  }
  0x33   : > { %591 = vmatprep.subr.bf16.mxu1 %v834_v44  ;;  %630 = vmatprep.subr.bf16.mxu0 %v876_v55  ;;  %v854_v62 = vld [vmem:[%s1053_s6 + $0x80] ss:$8 sps:$4 sm:$0xff]   ;;  %v855_v63 = vld [vmem:[%s1053_s6 + $0x94] ss:$8 sps:$4 sm:$0xff]   ;;  %v857_v0 = vld [vmem:[%s1053_s6 + $0x90] ss:$8 sps:$4 sm:$0xff]  }
  0x34   : > { %v858_v1 = vld [vmem:[%s1053_s6 + $0xa4] ss:$8 sps:$4 sm:$0xff]   ;;  %v860_v2 = vld [vmem:[%s1053_s6 + $0xa0] ss:$8 sps:$4 sm:$0xff]   ;;  %v861_v3 = vld [vmem:[%s1053_s6 + $0xb4] ss:$8 sps:$4 sm:$0xff]  }
  0x35   : > { %v863_v4 = vld [vmem:[%s1053_s6 + $0xb0] ss:$8 sps:$4 sm:$0xff]   ;;  %v864_v5 = vld [vmem:[%s1053_s6 + $0xc4] ss:$8 sps:$4 sm:$0xff]   ;;  %v866_v6 = vld [vmem:[%s1053_s6 + $0xc0] ss:$8 sps:$4 sm:$0xff]  }
  0x36   : > { %592 = vmatpush1.bf16.msra.mxu1 %v836_v45  ;;  %631 = vmatpush1.bf16.msra.mxu0 %v880_v57  ;;  %v867_v7 = vld [vmem:[%s1053_s6 + $0xd4] ss:$8 sps:$4 sm:$0xff]   ;;  %v869_v8 = vld [vmem:[%s1053_s6 + $0xd0] ss:$8 sps:$4 sm:$0xff]   ;;  %v872_v9 = vld [vmem:[%s1053_s6 + $0xe4] ss:$8 sps:$4 sm:$0xff]  }
  0x37   : > { %593 = vmatprep.subr.bf16.mxu1 %v837_v46  ;;  %v875_v10 = vld [vmem:[%s1053_s6 + $0xe0] ss:$8 sps:$4 sm:$0xff]   ;;  %v878_v11 = vld [vmem:[%s1053_s6 + $0xf4] ss:$8 sps:$4 sm:$0xff]   ;;  %v881_v12 = vld [vmem:[%s1053_s6 + $0xf0] ss:$8 sps:$4 sm:$0xff]  }
  0x38   : > { %s1119_s9 = smov (!%p343_p8, %s749_s9), 3 }
  0x39   : > { %790 = vmatmul.mubr.msk.bf16.vlgmr.msra.gmra.mrb[0].mxu0 %vm583_vm0, %v884_v59  ;;  %s750_s10 = sshll.u32 %s1119_s9, 2 }
  0x3a   : > { %594 = vmatpush1.bf16.msra.mxu1 %v839_v47  ;;  %s346_s17 = scalar_lea.vmem %s1114_s3, %s750_s10 }
  0x3b   : > { %595 = vmatprep.subr.bf16.mxu1 %v840_v48 }
  0x3e   : > { %596 = vmatpush1.bf16.msra.mxu1 %v842_v49 }
  0x3f   : > { %597 = vmatprep.subr.bf16.mxu1 %v843_v50 }
  0x42   : > { %598 = vmatpush1.bf16.msra.mxu1 %v845_v51 }
  0x43   : > { %599 = vmatprep.subr.bf16.mxu1 %v846_v53 }
  0x46   : > { %600 = vmatpush1.bf16.msra.mxu1 %v848_v56 }
  0x47   : > { %601 = vmatprep.subr.bf16.mxu1 %v849_v58 }
  0x4a   : > { %602 = vmatpush1.bf16.msra.mxu1 %v851_v60 }
  0x4b   : > { %603 = vmatprep.subr.bf16.mxu1 %v852_v61 }
  0x4e   : > { %604 = vmatpush1.bf16.msra.mxu1 %v854_v62 }
  0x4f   : > { %605 = vmatprep.subr.bf16.mxu1 %v855_v63 }
  0x52   : > { %606 = vmatpush1.bf16.msra.mxu1 %v857_v0 }
  0x53   : > { %607 = vmatprep.subr.bf16.mxu1 %v858_v1 }
  0x56   : > { %608 = vmatpush1.bf16.msra.mxu1 %v860_v2 }
  0x57   : > { %609 = vmatprep.subr.bf16.mxu1 %v861_v3 }
  0x5a   : > { %610 = vmatpush1.bf16.msra.mxu1 %v863_v4 }
  0x5b   : > { %611 = vmatprep.subr.bf16.mxu1 %v864_v5 }
  0x5e   : > { %612 = vmatpush1.bf16.msra.mxu1 %v866_v6 }
  0x5f   : > { %613 = vmatprep.subr.bf16.mxu1 %v867_v7 }
  0x62   : > { %614 = vmatpush1.bf16.msra.mxu1 %v869_v8 }
  0x63   : > { %615 = vmatprep.subr.bf16.mxu1 %v872_v9 }
  0x66   : > { %616 = vmatpush1.bf16.msra.mxu1 %v875_v10 }
  0x67   : > { %617 = vmatprep.subr.bf16.mxu1 %v878_v11 }
  0x6a   : > { %618 = vmatpush1.bf16.msra.mxu1 %v881_v12 }
  0x6d   : > { %620 = vmatmul.mubr.bf16.vlgmr.msra.gmra.mrb[0].mxu1 %v751_v13 }
  0xa8   : > { %v391_v18 = vpop.permute.xlu0 %390 }
 0x10c   : > { %v662_v14 = vpop.f32.mrb[0].mxu0 }
 0x10d   : > { %v664_v15 = vpop.f32.mrb[1].mxu0 }
 0x10e   : > { %v666_v16 = vpop.f32.mrb[2].mxu0 }
 0x10f   : > { %v667_v17 = vpop.f32.mrb[3].mxu0 }
 0x140   : > { %v621_v19 = vpop.f32.mrb[0].mxu1 }
 0x141   : > { %v622_v20 = vadd.f32 %v621_v19, %v391_v18  ;;  %v623_v21 = vpop.f32.mrb[1].mxu1 }
 0x142   : > { %v624_v22 = vadd.f32 %v623_v21, %v391_v18  ;;  %v625_v23 = vpop.f32.mrb[2].mxu1 }
 0x143   : > { %v663_v24 = vadd.f32 %v662_v14, %v622_v20  ;;  %v626_v25 = vpop.f32.mrb[3].mxu1 }
 0x144   : > { %v665_v26 = vadd.f32 %v664_v15, %v624_v22 }
 0x145   : > { %v669_v27 = vmax.f32 %v663_v24, 0.0 }
 0x146   : > { %v670_v28 = vmax.f32 %v665_v26, 0.0 }
 0x148   : > { %v795_v29 = vpack.c.bf16 %v670_v28, %v669_v27 }
 0x14a   : > { %679 = vst [vmem:[%s346_s17] sm:$0xff] %v795_v29 }
 0x14b PF: > { %p10_p9 = scmp.ge.s32.totalorder %s947_s16, 4   ;;  %s1115_s12 = smov %s903_s13 }
 0x14c   : > { %s1116_s13 = smov %s956_s19  ;;  %s1117_s14 = smov %s947_s16 }
 0x14d   :  { %12 = sbr.rel (!%p10_p9) target bundleno = 2 (0x2), region = 105 }

// kernel: generator_forward.15
= control target key start
LH: loop header
LB: loop body
LE: loop exit
PB: predicated region body
PF: predicated region fallthrough
CT: control target
= control target key end

     0   :  { %s652_s12 = smov 0   ;;  %s654_s13 = smov 0   ;;  %s750_s0 = inlined_call_operand.vmem [shape: bf16[3,144], index: 0, kind: input, shape index: {}]   ;;  %s751_s1 = inlined_call_operand.vmem [shape: bf16[144,512], index: 1, kind: input, shape index: {}]   ;;  %s752_s2 = inlined_call_operand.vmem [shape: f32[3,1], index: 2, kind: input, shape index: {}]   ;;  %s753_s3 = inlined_call_operand.vmem [shape: f32[3,512], index: 3, kind: output, shape index: {}]  }
   0x1   :  { %s656_s14 = smov 0  }
   0x2 LB: > { %s516_s15 = sadd.s32 4294967295, %s629_s14   ;;  %s669_s16 = sadd.s32 1, %s629_s14   ;;  %s629_s14 = sphi %s656_s14, %s756_s14   ;;  %s625_s13 = sphi %s654_s13, %s755_s13   ;;  %s621_s12 = sphi %s652_s12, %s754_s12  }
   0x3   : > { %s38_s17 = ssub.s32 %s629_s14, %s669_s16  ;;  %s41_s18 = sadd.s32 1, %s625_s13 }
   0x4   : > { %p39_p0 = scmp.eq.s32.totalorder %s38_s17, 0  ;;  %p48_p1 = scmp.ne.s32.totalorder %s625_s13, %s621_s12 }
   0x5   : > { %p49_p2 = scmp.eq.s32.totalorder %s629_s14, 0  ;;  %p519_p4 = scmp.ge.s32.totalorder %s629_s14, 2 }
   0x6   : > { %s678_s19 = scalar_select %p39_p0, %s625_s13, %s41_s18  }
   0x7   : > { %p50_p3 = por %p49_p2, %p48_p1  ;;  %127 = sbr.rel (%p519_p4) target bundleno = 27 (0x1b), region = 24 }
   0xe   : > { %130 = sbr.rel (!%p50_p3) target bundleno = 27 (0x1b), region = 28  ;;  %s132_s20 = sand.u32 (%p50_p3), 1, %s625_s13  }
   0xf   : > { %s547_s21 = sshll.u32 (%p50_p3), %s629_s14, 3  ;;  %s548_s22 = smul.u32 (%p50_p3), 144, %s132_s20 }
  0x10   : > { %s686_s25 = scalar_lea.vmem (%p50_p3), %s751_s1, %s547_s21 }
  0x11   : > { %v199_v0 = vld [vmem:[%s686_s25] sm:$0xff] (%p50_p3)  ;;  %v201_v1 = vld [vmem:[%s686_s25 + $0x10] sm:$0xff] (%p50_p3)  ;;  %s134_s26 = scalar_lea.vmem (%p50_p3), [#allocation2], %s548_s22 }
  0x12   : > { %v203_v2 = vld [vmem:[%s686_s25 + $0x20] sm:$0xff] (%p50_p3)  ;;  %v205_v3 = vld [vmem:[%s686_s25 + $0x30] sm:$0xff] (%p50_p3)  ;;  %200 = vst [vmem:[%s134_s26] sm:$0xff] (%p50_p3), %v199_v0  ;;  %202 = vst [vmem:[%s134_s26 + $0x8] sm:$0xff] (%p50_p3), %v201_v1 }
  0x13   : > { %v207_v4 = vld [vmem:[%s686_s25 + $0x40] sm:$0xff] (%p50_p3)  ;;  %v209_v5 = vld [vmem:[%s686_s25 + $0x50] sm:$0xff] (%p50_p3)  ;;  %204 = vst [vmem:[%s134_s26 + $0x10] sm:$0xff] (%p50_p3), %v203_v2  ;;  %206 = vst [vmem:[%s134_s26 + $0x18] sm:$0xff] (%p50_p3), %v205_v3 }
  0x14   : > { %208 = vst [vmem:[%s134_s26 + $0x20] sm:$0xff] (%p50_p3), %v207_v4  ;;  %210 = vst [vmem:[%s134_s26 + $0x28] sm:$0xff] (%p50_p3), %v209_v5  ;;  %v211_v6 = vld [vmem:[%s686_s25 + $0x60] sm:$0xff] (%p50_p3)  ;;  %v213_v7 = vld [vmem:[%s686_s25 + $0x70] sm:$0xff] (%p50_p3) }
  0x15   : > { %v215_v8 = vld [vmem:[%s686_s25 + $0x80] sm:$0xff]  ;;  %212 = vst [vmem:[%s134_s26 + $0x30] sm:$0xff] %v211_v6  ;;  %214 = vst [vmem:[%s134_s26 + $0x38] sm:$0xff] %v213_v7  ;;  %v217_v9 = vld [vmem:[%s686_s25 + $0x90] sm:$0xff] }
  0x16   : > { %216 = vst [vmem:[%s134_s26 + $0x40] sm:$0xff] %v215_v8  ;;  %v219_v10 = vld [vmem:[%s686_s25 + $0xa0] sm:$0xff]  ;;  %v221_v11 = vld [vmem:[%s686_s25 + $0xb0] sm:$0xff]  ;;  %218 = vst [vmem:[%s134_s26 + $0x48] sm:$0xff] %v217_v9 }
  0x17   : > { %220 = vst [vmem:[%s134_s26 + $0x50] sm:$0xff] %v219_v10  ;;  %222 = vst [vmem:[%s134_s26 + $0x58] sm:$0xff] %v221_v11  ;;  %v223_v12 = vld [vmem:[%s686_s25 + $0xc0] sm:$0xff]  ;;  %v225_v13 = vld [vmem:[%s686_s25 + $0xd0] sm:$0xff] }
  0x18   : > { %v227_v14 = vld [vmem:[%s686_s25 + $0xe0] sm:$0xff]  ;;  %224 = vst [vmem:[%s134_s26 + $0x60] sm:$0xff] %v223_v12  ;;  %226 = vst [vmem:[%s134_s26 + $0x68] sm:$0xff] %v225_v13  ;;  %v229_v15 = vld [vmem:[%s686_s25 + $0xf0] sm:$0xff] }
  0x19   : > { %228 = vst [vmem:[%s134_s26 + $0x70] sm:$0xff] %v227_v14  ;;  %v231_v16 = vld [vmem:[%s686_s25 + $0x100] sm:$0xff]  ;;  %v233_v17 = vld [vmem:[%s686_s25 + $0x110] sm:$0xff]  ;;  %230 = vst [vmem:[%s134_s26 + $0x78] sm:$0xff] %v229_v15 }
  0x1a   : > { %232 = vst [vmem:[%s134_s26 + $0x80] sm:$0xff] %v231_v16  ;;  %234 = vst [vmem:[%s134_s26 + $0x88] sm:$0xff] %v233_v17 }
  0x1b PF: > { %p522_p5 = scmp.ge.s32.totalorder %s629_s14, 1  ;;  %p239_p6 = scmp.lt.s32.totalorder %s629_s14, 3 }
  0x1d   : > { %p240_p7 = pnand %p522_p5, %p239_p6 }
  0x1e   : > { %s246_s27 = sand.u32 (!%p240_p7), 1, %s621_s12   ;;  %v525_v18 = vld.sshfl [vmem:[%s750_s0] sm:$0x33 pattern:$0x76325410] (!%p240_p7)  ;;  %vm402_vm0 = vcmask (!%p240_p7), 130048  }
  0x1f   : > { %243 = sbr.rel (%p240_p7) target bundleno = 301 (0x12d), region = 66  ;;  %v310_v19 = vcombine.high (!%p240_p7), %v525_v18, %v525_v18  ;;  %v296_v20 = vld [vmem:[%s752_s2] sm:$0x7] (!%p240_p7)  ;;  %v631_v21 = vmov (!%p240_p7), 0   ;;  %s523_s7 = sshll.u32 (!%p240_p7), %s516_s15, 1 }
  0x20   : > { %s549_s30 = smul.u32 (!%p240_p7), 144, %s246_s27  ;;  %575 = vset.pattern.permute.xlu0 (!%p240_p7), %v631_v21  ;;  %p271_p8 = scmp.lt.s32.totalorder (!%p240_p7), %s523_s7, 3 }
  0x21   : > { %544 = vmatprep.mubr.msk.bf16.mxu0 (!%p240_p7), %vm402_vm0, %v310_v19  ;;  %299 = vperm.xlu0 (!%p240_p7), %575, %v296_v20  }
  0x22   : > { %s715_s6 = scalar_lea.vmem (!%p240_p7), [#allocation2], %s549_s30 }
  0x23   : > { %v576_v22 = vld [vmem:[%s715_s6 + $0x4] ss:$8 sps:$4 sm:$0xff] (!%p240_p7)   ;;  %v578_v23 = vld [vmem:[%s715_s6] ss:$8 sps:$4 sm:$0xff] (!%p240_p7)   ;;  %v579_v24 = vld [vmem:[%s715_s6 + $0x14] ss:$8 sps:$4 sm:$0xff] (!%p240_p7)  }
  0x24   : > { %406 = vmatprep.subr.bf16.mxu0 (!%p240_p7), %v576_v22  ;;  %v581_v25 = vld [vmem:[%s715_s6 + $0x10] ss:$8 sps:$4 sm:$0xff] (!%p240_p7)   ;;  %v582_v26 = vld [vmem:[%s715_s6 + $0x24] ss:$8 sps:$4 sm:$0xff] (!%p240_p7)   ;;  %v584_v27 = vld [vmem:[%s715_s6 + $0x20] ss:$8 sps:$4 sm:$0xff] (!%p240_p7)  }
  0x25   : > { %407 = vmatpush1.bf16.msra.mxu0 (!%p240_p7), %v578_v23  ;;  %v585_v28 = vld [vmem:[%s715_s6 + $0x34] ss:$8 sps:$4 sm:$0xff] (!%p240_p7)   ;;  %v587_v29 = vld [vmem:[%s715_s6 + $0x30] ss:$8 sps:$4 sm:$0xff] (!%p240_p7)   ;;  %v588_v30 = vld [vmem:[%s715_s6 + $0x44] ss:$8 sps:$4 sm:$0xff] (!%p240_p7)  }
  0x26   : > { %408 = vmatprep.subr.bf16.mxu0 %v579_v24  ;;  %v590_v31 = vld [vmem:[%s715_s6 + $0x40] ss:$8 sps:$4 sm:$0xff]   ;;  %v591_v32 = vld [vmem:[%s715_s6 + $0x54] ss:$8 sps:$4 sm:$0xff]   ;;  %v593_v33 = vld [vmem:[%s715_s6 + $0x50] ss:$8 sps:$4 sm:$0xff]  }
  0x27   : > { %v594_v34 = vld [vmem:[%s715_s6 + $0x64] ss:$8 sps:$4 sm:$0xff]   ;;  %v596_v35 = vld [vmem:[%s715_s6 + $0x60] ss:$8 sps:$4 sm:$0xff]   ;;  %v597_v36 = vld [vmem:[%s715_s6 + $0x74] ss:$8 sps:$4 sm:$0xff]  }
  0x28   : > { %v599_v37 = vld [vmem:[%s715_s6 + $0x70] ss:$8 sps:$4 sm:$0xff]   ;;  %v600_v38 = vld [vmem:[%s715_s6 + $0x84] ss:$8 sps:$4 sm:$0xff]   ;;  %v602_v39 = vld [vmem:[%s715_s6 + $0x80] ss:$8 sps:$4 sm:$0xff]  }
  0x29   : > { %409 = vmatpush1.bf16.msra.mxu0 %v581_v25  ;;  %s758_s7 = smov (!%p271_p8, %s523_s7), 3 }
  0x2a   : > { %410 = vmatprep.subr.bf16.mxu0 %v582_v26  ;;  %s524_s8 = sshll.u32 %s758_s7, 2 }
  0x2b   : > { %s274_s11 = scalar_lea.vmem %s753_s3, %s524_s8 }
  0x2d   : > { %411 = vmatpush1.bf16.msra.mxu0 %v584_v27 }
  0x2e   : > { %412 = vmatprep.subr.bf16.mxu0 %v585_v28 }
  0x31   : > { %413 = vmatpush1.bf16.msra.mxu0 %v587_v29 }
  0x32   : > { %414 = vmatprep.subr.bf16.mxu0 %v588_v30 }
  0x35   : > { %415 = vmatpush1.bf16.msra.mxu0 %v590_v31 }
  0x36   : > { %416 = vmatprep.subr.bf16.mxu0 %v591_v32 }
  0x39   : > { %417 = vmatpush1.bf16.msra.mxu0 %v593_v33 }
  0x3a   : > { %418 = vmatprep.subr.bf16.mxu0 %v594_v34 }
  0x3d   : > { %419 = vmatpush1.bf16.msra.mxu0 %v596_v35 }
  0x3e   : > { %420 = vmatprep.subr.bf16.mxu0 %v597_v36 }
  0x41   : > { %421 = vmatpush1.bf16.msra.mxu0 %v599_v37 }
  0x42   : > { %422 = vmatprep.subr.bf16.mxu0 %v600_v38 }
  0x45   : > { %423 = vmatpush1.bf16.msra.mxu0 %v602_v39 }
  0x48   : > { %439 = vmatmul.mubr.bf16.vlgmr.msra.gmra.mrb[0].mxu0 %v525_v18 }
  0xa0   : > { %v300_v40 = vpop.permute.xlu0 %299 }
 0x11b   : > { %v440_v41 = vpop.f32.mrb[0].mxu0 }
 0x11c   : > { %v441_v42 = vadd.f32 %v440_v41, %v300_v40  ;;  %v442_v43 = vpop.f32.mrb[1].mxu0 }
 0x11d   : > { %v443_v44 = vadd.f32 %v442_v43, %v300_v40  ;;  %v444_v45 = vpop.f32.mrb[2].mxu0 }
 0x11e   : > { %603 = vtanh.f32 %v441_v42  ;;  %v445_v46 = vpop.f32.mrb[3].mxu0 }
 0x11f   : > { %605 = vtanh.f32 %v443_v44 }
 0x128   : > { %v604_v47 = vpop.eup %603 }
 0x129   : > { %v606_v48 = vpop.eup %605 }
 0x12a   : > { %v451_v49 = vcombine.low %v604_v47, %v606_v48 }
 0x12c   : > { %453 = vst [vmem:[%s274_s11] sm:$0x77] %v451_v49 }
 0x12d PF: > { %p10_p9 = scmp.ge.s32.totalorder %s669_s16, 4   ;;  %s754_s12 = smov %s625_s13 }
 0x12e   : > { %s755_s13 = smov %s678_s19  ;;  %s756_s14 = smov %s669_s16 }
 0x12f   :  { %12 = sbr.rel (!%p10_p9) target bundleno = 2 (0x2), region = 105 }

</bundles_post_ra>
